<compile_context>
chip_gen: v5e
topology: v5e:2x2
jax: 0.10.0
libtpu: 0.0.40
codegen_flags: <defaults>
</compile_context>

<pallas_src>
import functools

import jax
import jax.numpy as jnp
from jax import lax
from jax.experimental import pallas as pl
from jax.experimental.pallas import tpu as pltpu

KSIZE = 3
PAD = 1
MAX_IMAGES_PER_STEP = 8   # review: B ~ 8-16; 8 keeps VMEM tiny on every generation


def _shift_lanes(v, off):
    """s[:, p] = v[:, p + off], zero-filled where p + off falls outside [0, P).

    Pure lane-axis shift (static slice + concat -> XLU lane rotation); the sublane
    (channel) axis is never touched.
    """
    if off == 0:
        return v
    c, _ = v.shape
    fill = jnp.zeros((c, abs(off)), v.dtype)
    if off > 0:
        return jnp.concatenate([v[:, off:], fill], axis=1)
    return jnp.concatenate([fill, v[:, :off]], axis=1)


def _resblock_kernel(x_ref, w1_ref, b1_ref, w2_ref, b2_ref, o_ref, stk_ref, *, img_w):
    """One grid step = B images.

    x_ref  : (B, C, P) f32, P = H*W row-major flattened (no spatial padding)
    w*_ref : (C, 9C) bf16 folded depthwise+pointwise weight
    b*_ref : (C, 1)  f32 folded bias
    o_ref  : (B, C, P) f32
    stk_ref: (9C, B*P) bf16 persistent im2col scratch, reused by conv1 and conv2
    """
    bsz, c, p = x_ref.shape

    # Column-validity masks for horizontal taps (a few VPU ops, once per step).
    col = lax.broadcasted_iota(jnp.int32, (1, p), 1) % img_w
    cm_left = col > 0              # source column col-1 exists
    cm_right = col < (img_w - 1)   # source column col+1 exists

    def fill_im2col(vb_f32, b):
        """Write the 9 masked taps of one image (C, P) into the scratch, lane block b."""
        vb = vb_f32.astype(jnp.bfloat16)          # bf16 im2col (halves store traffic)
        u = {
            -1: jnp.where(cm_left, _shift_lanes(vb, -1), 0.0),
            0: vb,
            1: jnp.where(cm_right, _shift_lanes(vb, 1), 0.0),
        }
        t = 0
        for dh in (-PAD, 0, PAD):
            for dw in (-PAD, 0, PAD):
                # vertical moves are whole-row (img_w-lane) shifts; out-of-image rows
                # zero-fill at the [0, P) boundary, so no row mask is needed and no
                # cross-image bleed can occur (each image is shifted separately).
                stk_ref[t * c:(t + 1) * c, b * p:(b + 1) * p] = _shift_lanes(u[dw], dh * img_w)
                t += 1

    def conv_fold(w_ref, b_ref):
        # (C, 9C) x (9C, B*P) bf16 MXU matmul, f32 accumulation, f32 folded bias.
        return jnp.dot(w_ref[...], stk_ref[...],
                       preferred_element_type=jnp.float32) + b_ref[...]

    # conv1 (depthwise3x3 + 1x1 folded) -> ReLU
    for b in range(bsz):
        fill_im2col(x_ref[b], b)
    y = jnp.maximum(conv_fold(w1_ref, b1_ref), 0.0)       # (C, B*P) f32

    # conv2 (taps rebuilt per image; 256-lane-aligned slices of y are free)
    for b in range(bsz):
        fill_im2col(y[:, b * p:(b + 1) * p], b)
    z = conv_fold(w2_ref, b2_ref)                          # (C, B*P) f32

    # residual add; output tiles are lane-dense (C, P) stores
    for b in range(bsz):
        o_ref[b] = (x_ref[b] + z[:, b * p:(b + 1) * p]).astype(o_ref.dtype)


def _fold_conv(dw_pt, db, pw_pt, pb):
    """Fold (depthwise 3x3 weight (C,1,3,3), bias) + (1x1 weight (C,C,1,1), bias)
    into a (C, 9C) bf16 matmul weight and a (C, 1) f32 bias."""
    c = dw_pt.shape[0]
    dwt = dw_pt[:, 0].reshape(c, KSIZE * KSIZE)           # (C_in, 9), tap = kh*3 + kw
    pw = pw_pt[:, :, 0, 0]                                 # (C_out, C_in)
    wfold = jnp.einsum('oc,ct->otc', pw, dwt).reshape(c, KSIZE * KSIZE * c)
    bfold = (pw @ db + pb).reshape(c, 1)
    return wfold.astype(jnp.bfloat16), bfold.astype(jnp.float32)


def _pick_images_per_step(n):
    if n <= 1:
        return 1
    # keep the grid >= 2 steps so both v7x TensorCores get work, cap per-step batch
    return max(1, min(MAX_IMAGES_PER_STEP, -(-n // 2)))


def resblock_pallas(x, params):
    """x: (N, C, H, W) float32 (PyTorch NCHW). params: PyTorch-shaped weights."""
    n, c, h, w = x.shape
    p = h * w                                              # 16*16 = 256 -> lane-dense

    w1, b1 = _fold_conv(params['dw1'], params['db1'], params['pw1'], params['pb1'])
    w2, b2 = _fold_conv(params['dw2'], params['db2'], params['pw2'], params['pb2'])

    bsz = _pick_images_per_step(n)
    grid = -(-n // bsz)
    npad = grid * bsz

    xr = x.reshape(n, c, p)                                # contiguous, no HBM pad pass
    if npad != n:
        xr = jnp.pad(xr, ((0, npad - n), (0, 0), (0, 0)))  # only when N % B != 0

    nine_c = KSIZE * KSIZE * c
    grid_spec = pltpu.PrefetchScalarGridSpec(
        num_scalar_prefetch=0,
        grid=(grid,),
        in_specs=[
            pl.BlockSpec((bsz, c, p), lambda i: (i, 0, 0)),   # B images / step
            pl.BlockSpec((c, nine_c), lambda i: (0, 0)),      # folded conv1 weight bf16
            pl.BlockSpec((c, 1), lambda i: (0, 0)),           # folded conv1 bias f32
            pl.BlockSpec((c, nine_c), lambda i: (0, 0)),      # folded conv2 weight bf16
            pl.BlockSpec((c, 1), lambda i: (0, 0)),           # folded conv2 bias f32
        ],
        out_specs=pl.BlockSpec((bsz, c, p), lambda i: (i, 0, 0)),
        scratch_shapes=[pltpu.VMEM((nine_c, bsz * p), jnp.bfloat16)],  # shared im2col
    )

    mm_flops = 2 * c * nine_c * p                          # per conv, per image
    cost = pl.CostEstimate(
        flops=int(npad * (2 * mm_flops + 6 * c * p)),
        transcendentals=0,
        bytes_accessed=int(8 * npad * c * p + 2 * (w1.size + w2.size)
                           + 4 * (b1.size + b2.size)),
    )

    out = pl.pallas_call(
        functools.partial(_resblock_kernel, img_w=w),
        out_shape=jax.ShapeDtypeStruct((npad, c, p), x.dtype),
        grid_spec=grid_spec,
        compiler_params=pltpu.CompilerParams(
            dimension_semantics=("parallel",)),            # shard steps across TCs
        cost_estimate=cost,
    )(xr, w1, b1, w2, b2)

    return out[:n].reshape(n, c, h, w)


def make_params(key, channel=32):
    """Deterministic synthetic parameters with PyTorch nn.Conv2d shapes."""
    ks = jax.random.split(key, 8)
    s = 0.1
    return {
        'dw1': s * jax.random.normal(ks[0], (channel, 1, KSIZE, KSIZE), jnp.float32),
        'db1': s * jax.random.normal(ks[1], (channel,), jnp.float32),
        'pw1': s * jax.random.normal(ks[2], (channel, channel, 1, 1), jnp.float32),
        'pb1': s * jax.random.normal(ks[3], (channel,), jnp.float32),
        'dw2': s * jax.random.normal(ks[4], (channel, 1, KSIZE, KSIZE), jnp.float32),
        'db2': s * jax.random.normal(ks[5], (channel,), jnp.float32),
        'pw2': s * jax.random.normal(ks[6], (channel, channel, 1, 1), jnp.float32),
        'pb2': s * jax.random.normal(ks[7], (channel,), jnp.float32),
    }


def resblock_reference(x, params):
    """Pure-JAX f32 NCHW reference mirroring the PyTorch forward exactly."""
    _, c, h, w = x.shape

    def depthwise(v, wt, b):                               # wt: (C, 1, 3, 3)
        vp = jnp.pad(v, ((0, 0), (0, 0), (PAD, PAD), (PAD, PAD)))
        out = jnp.zeros_like(v)
        for kh in range(KSIZE):
            for kw in range(KSIZE):
                out = out + vp[:, :, kh:kh + h, kw:kw + w] * wt[:, 0, kh, kw].reshape(1, c, 1, 1)
        return out + b.reshape(1, c, 1, 1)

    def pointwise(v, wt, b):                               # wt: (C, C, 1, 1)
        return jnp.einsum('nchw,oc->nohw', v, wt[:, :, 0, 0]) + b.reshape(1, c, 1, 1)

    y = jnp.maximum(pointwise(depthwise(x, params['dw1'], params['db1']),
                              params['pw1'], params['pb1']), 0.0)
    z = pointwise(depthwise(y, params['dw2'], params['db2']),
                  params['pw2'], params['pb2'])
    return x + z


if __name__ == "__main__":
    C, H, W = 32, 16, 16                  # module default channel=32
    key = jax.random.PRNGKey(0)
    kx, kp, kx2 = jax.random.split(key, 3)
    params = make_params(kp, channel=C)
    fwd = jax.jit(resblock_pallas)

    # Primary check (B=1 per step, grid=2).  Tolerance accounts for bf16 MXU inputs.
    x = jax.random.normal(kx, (2, C, H, W), jnp.float32)
    out = jax.block_until_ready(fwd(x, params))
    ref = resblock_reference(x, params)
    assert out.shape == x.shape
    err = float(jnp.max(jnp.abs(out - ref)))
    assert err < 2e-2, f"mismatch vs reference: max abs err {err}"

    # Second check exercises the multi-image-per-step path (B=3, grid=2) + batch padding.
    x2 = jax.random.normal(kx2, (5, C, H, W), jnp.float32)
    out2 = jax.block_until_ready(fwd(x2, params))
    ref2 = resblock_reference(x2, params)
    err2 = float(jnp.max(jnp.abs(out2 - ref2)))
    assert err2 < 2e-2, f"batched mismatch vs reference: max abs err {err2}"

    print("KERNEL_OK")
</pallas_src>

<mosaic_0001>
module attributes {stable_mosaic.version = 11 : i64} {
  func.func @_resblock_kernel(%arg0: i32, %arg1: memref<1x32x256xf32, #tpu.memory_space<vmem>>, %arg2: memref<32x288xbf16, #tpu.memory_space<vmem>>, %arg3: memref<32x1xf32, #tpu.memory_space<vmem>>, %arg4: memref<32x288xbf16, #tpu.memory_space<vmem>>, %arg5: memref<32x1xf32, #tpu.memory_space<vmem>>, %arg6: memref<1x32x256xf32, #tpu.memory_space<vmem>>, %arg7: memref<288x256xbf16, #tpu.memory_space<vmem>>) attributes {dimension_semantics = [#tpu.dimension_semantics<parallel>], iteration_bounds = array<i64: 2>, scalar_prefetch = 0 : i64, scratch_operands = 1 : i64, tpu.core_type = #tpu.core_type<tc>, window_params = [{transform_indices = @transform_0, window_bounds = array<i64: 1, 32, 256>}, {pipeline_mode = #tpu.pipeline_mode<synchronous>, transform_indices = @transform_1, window_bounds = array<i64: 32, 288>}, {pipeline_mode = #tpu.pipeline_mode<synchronous>, transform_indices = @transform_2, window_bounds = array<i64: 32, 1>}, {pipeline_mode = #tpu.pipeline_mode<synchronous>, transform_indices = @transform_3, window_bounds = array<i64: 32, 288>}, {pipeline_mode = #tpu.pipeline_mode<synchronous>, transform_indices = @transform_4, window_bounds = array<i64: 32, 1>}, {transform_indices = @transform_5, window_bounds = array<i64: 1, 32, 256>}]} {
    %0 = tpu.iota {dimensions = array<i32: 1>} : vector<1x256xi32>
    %c16_i32 = arith.constant 16 : i32
    %c0_i32 = arith.constant 0 : i32
    %1 = arith.cmpi eq, %c16_i32, %c0_i32 : i32
    %c1_i32 = arith.constant 1 : i32
    %2 = arith.select %1, %c1_i32, %c16_i32 : i32
    %3 = vector.broadcast %2 : i32 to vector<1x256xi32>
    %4 = arith.remsi %0, %3 : vector<1x256xi32>
    %c0_i32_0 = arith.constant 0 : i32
    %5 = vector.broadcast %c0_i32_0 : i32 to vector<1x256xi32>
    %6 = arith.cmpi ne, %4, %5 : vector<1x256xi32>
    %c0_i32_1 = arith.constant 0 : i32
    %7 = vector.broadcast %c0_i32_1 : i32 to vector<1x256xi32>
    %8 = arith.cmpi slt, %4, %7 : vector<1x256xi32>
    %c0_i32_2 = arith.constant 0 : i32
    %9 = arith.cmpi slt, %2, %c0_i32_2 : i32
    %10 = vector.broadcast %9 : i1 to vector<1x256xi1>
    %11 = vector.broadcast %10 : vector<1x256xi1> to vector<1x256xi1>
    %12 = arith.xori %8, %11 : vector<1x256xi1>
    %13 = arith.andi %12, %6 : vector<1x256xi1>
    %14 = vector.broadcast %2 : i32 to vector<1x256xi32>
    %15 = arith.addi %4, %14 : vector<1x256xi32>
    %16 = arith.select %13, %15, %4 : vector<1x256xi1>, vector<1x256xi32>
    %c0_i32_3 = arith.constant 0 : i32
    %17 = vector.broadcast %c0_i32_3 : i32 to vector<1x256xi32>
    %18 = arith.cmpi sgt, %16, %17 : vector<1x256xi32>
    %c15_i32 = arith.constant 15 : i32
    %19 = vector.broadcast %c15_i32 : i32 to vector<1x256xi32>
    %20 = arith.cmpi slt, %16, %19 : vector<1x256xi32>
    %c0 = arith.constant 0 : index
    %c0_4 = arith.constant 0 : index
    %c0_5 = arith.constant 0 : index
    %21 = vector.load %arg1[%c0, %c0_4, %c0_5] : memref<1x32x256xf32, #tpu.memory_space<vmem>>, vector<1x32x256xf32>
    %22 = vector.shape_cast %21 : vector<1x32x256xf32> to vector<32x256xf32>
    %23 = arith.truncf %22 : vector<32x256xf32> to vector<32x256xbf16>
    %cst = arith.constant 0.000000e+00 : bf16
    %24 = vector.broadcast %cst : bf16 to vector<32x1xbf16>
    %25 = vector.extract_strided_slice %23 {offsets = [0, 0], sizes = [32, 255], strides = [1, 1]} : vector<32x256xbf16> to vector<32x255xbf16>
    %26 = tpu.concatenate %24, %25 in 1 : vector<32x1xbf16>, vector<32x255xbf16> -> vector<32x256xbf16>
    %cst_6 = arith.constant 0.000000e+00 : f32
    %27 = arith.truncf %cst_6 : f32 to bf16
    %28 = vector.shape_cast %18 : vector<1x256xi1> to vector<1x256xi1>
    %29 = vector.broadcast %28 : vector<1x256xi1> to vector<32x256xi1>
    %30 = vector.broadcast %27 : bf16 to vector<32x256xbf16>
    %31 = arith.select %29, %26, %30 : vector<32x256xi1>, vector<32x256xbf16>
    %cst_7 = arith.constant 0.000000e+00 : bf16
    %32 = vector.broadcast %cst_7 : bf16 to vector<32x1xbf16>
    %33 = vector.extract_strided_slice %23 {offsets = [0, 1], sizes = [32, 255], strides = [1, 1]} : vector<32x256xbf16> to vector<32x255xbf16>
    %34 = tpu.concatenate %33, %32 in 1 : vector<32x255xbf16>, vector<32x1xbf16> -> vector<32x256xbf16>
    %cst_8 = arith.constant 0.000000e+00 : f32
    %35 = arith.truncf %cst_8 : f32 to bf16
    %36 = vector.shape_cast %20 : vector<1x256xi1> to vector<1x256xi1>
    %37 = vector.broadcast %36 : vector<1x256xi1> to vector<32x256xi1>
    %38 = vector.broadcast %35 : bf16 to vector<32x256xbf16>
    %39 = arith.select %37, %34, %38 : vector<32x256xi1>, vector<32x256xbf16>
    %cst_9 = arith.constant 0.000000e+00 : bf16
    %40 = vector.broadcast %cst_9 : bf16 to vector<32x16xbf16>
    %41 = vector.extract_strided_slice %31 {offsets = [0, 0], sizes = [32, 240], strides = [1, 1]} : vector<32x256xbf16> to vector<32x240xbf16>
    %42 = tpu.concatenate %40, %41 in 1 : vector<32x16xbf16>, vector<32x240xbf16> -> vector<32x256xbf16>
    %c0_10 = arith.constant 0 : index
    %c0_11 = arith.constant 0 : index
    %43 = vector.load %arg7[%c0_10, %c0_11] : memref<288x256xbf16, #tpu.memory_space<vmem>>, vector<32x256xbf16>
    tpu.vector_store %arg7[%c0_10, %c0_11], %42 {strides = array<i32>} : memref<288x256xbf16, #tpu.memory_space<vmem>>, vector<32x256xbf16>,
    %cst_12 = arith.constant 0.000000e+00 : bf16
    %44 = vector.broadcast %cst_12 : bf16 to vector<32x16xbf16>
    %45 = vector.extract_strided_slice %23 {offsets = [0, 0], sizes = [32, 240], strides = [1, 1]} : vector<32x256xbf16> to vector<32x240xbf16>
    %46 = tpu.concatenate %44, %45 in 1 : vector<32x16xbf16>, vector<32x240xbf16> -> vector<32x256xbf16>
    %c32 = arith.constant 32 : index
    %c0_13 = arith.constant 0 : index
    %47 = vector.load %arg7[%c32, %c0_13] : memref<288x256xbf16, #tpu.memory_space<vmem>>, vector<32x256xbf16>
    tpu.vector_store %arg7[%c32, %c0_13], %46 {strides = array<i32>} : memref<288x256xbf16, #tpu.memory_space<vmem>>, vector<32x256xbf16>,
    %cst_14 = arith.constant 0.000000e+00 : bf16
    %48 = vector.broadcast %cst_14 : bf16 to vector<32x16xbf16>
    %49 = vector.extract_strided_slice %39 {offsets = [0, 0], sizes = [32, 240], strides = [1, 1]} : vector<32x256xbf16> to vector<32x240xbf16>
    %50 = tpu.concatenate %48, %49 in 1 : vector<32x16xbf16>, vector<32x240xbf16> -> vector<32x256xbf16>
    %c64 = arith.constant 64 : index
    %c0_15 = arith.constant 0 : index
    %51 = vector.load %arg7[%c64, %c0_15] : memref<288x256xbf16, #tpu.memory_space<vmem>>, vector<32x256xbf16>
    tpu.vector_store %arg7[%c64, %c0_15], %50 {strides = array<i32>} : memref<288x256xbf16, #tpu.memory_space<vmem>>, vector<32x256xbf16>,
    %c96 = arith.constant 96 : index
    %c0_16 = arith.constant 0 : index
    %52 = vector.load %arg7[%c96, %c0_16] : memref<288x256xbf16, #tpu.memory_space<vmem>>, vector<32x256xbf16>
    tpu.vector_store %arg7[%c96, %c0_16], %31 {strides = array<i32>} : memref<288x256xbf16, #tpu.memory_space<vmem>>, vector<32x256xbf16>,
    %c128 = arith.constant 128 : index
    %c0_17 = arith.constant 0 : index
    %53 = vector.load %arg7[%c128, %c0_17] : memref<288x256xbf16, #tpu.memory_space<vmem>>, vector<32x256xbf16>
    tpu.vector_store %arg7[%c128, %c0_17], %23 {strides = array<i32>} : memref<288x256xbf16, #tpu.memory_space<vmem>>, vector<32x256xbf16>,
    %c160 = arith.constant 160 : index
    %c0_18 = arith.constant 0 : index
    %54 = vector.load %arg7[%c160, %c0_18] : memref<288x256xbf16, #tpu.memory_space<vmem>>, vector<32x256xbf16>
    tpu.vector_store %arg7[%c160, %c0_18], %39 {strides = array<i32>} : memref<288x256xbf16, #tpu.memory_space<vmem>>, vector<32x256xbf16>,
    %cst_19 = arith.constant 0.000000e+00 : bf16
    %55 = vector.broadcast %cst_19 : bf16 to vector<32x16xbf16>
    %56 = vector.extract_strided_slice %31 {offsets = [0, 16], sizes = [32, 240], strides = [1, 1]} : vector<32x256xbf16> to vector<32x240xbf16>
    %57 = tpu.concatenate %56, %55 in 1 : vector<32x240xbf16>, vector<32x16xbf16> -> vector<32x256xbf16>
    %c192 = arith.constant 192 : index
    %c0_20 = arith.constant 0 : index
    %58 = vector.load %arg7[%c192, %c0_20] : memref<288x256xbf16, #tpu.memory_space<vmem>>, vector<32x256xbf16>
    tpu.vector_store %arg7[%c192, %c0_20], %57 {strides = array<i32>} : memref<288x256xbf16, #tpu.memory_space<vmem>>, vector<32x256xbf16>,
    %cst_21 = arith.constant 0.000000e+00 : bf16
    %59 = vector.broadcast %cst_21 : bf16 to vector<32x16xbf16>
    %60 = vector.extract_strided_slice %23 {offsets = [0, 16], sizes = [32, 240], strides = [1, 1]} : vector<32x256xbf16> to vector<32x240xbf16>
    %61 = tpu.concatenate %60, %59 in 1 : vector<32x240xbf16>, vector<32x16xbf16> -> vector<32x256xbf16>
    %c224 = arith.constant 224 : index
    %c0_22 = arith.constant 0 : index
    %62 = vector.load %arg7[%c224, %c0_22] : memref<288x256xbf16, #tpu.memory_space<vmem>>, vector<32x256xbf16>
    tpu.vector_store %arg7[%c224, %c0_22], %61 {strides = array<i32>} : memref<288x256xbf16, #tpu.memory_space<vmem>>, vector<32x256xbf16>,
    %cst_23 = arith.constant 0.000000e+00 : bf16
    %63 = vector.broadcast %cst_23 : bf16 to vector<32x16xbf16>
    %64 = vector.extract_strided_slice %39 {offsets = [0, 16], sizes = [32, 240], strides = [1, 1]} : vector<32x256xbf16> to vector<32x240xbf16>
    %65 = tpu.concatenate %64, %63 in 1 : vector<32x240xbf16>, vector<32x16xbf16> -> vector<32x256xbf16>
    %c256 = arith.constant 256 : index
    %c0_24 = arith.constant 0 : index
    %66 = vector.load %arg7[%c256, %c0_24] : memref<288x256xbf16, #tpu.memory_space<vmem>>, vector<32x256xbf16>
    tpu.vector_store %arg7[%c256, %c0_24], %65 {strides = array<i32>} : memref<288x256xbf16, #tpu.memory_space<vmem>>, vector<32x256xbf16>,
    %c0_25 = arith.constant 0 : index
    %c0_26 = arith.constant 0 : index
    %67 = vector.load %arg2[%c0_25, %c0_26] : memref<32x288xbf16, #tpu.memory_space<vmem>>, vector<32x288xbf16>
    %c0_27 = arith.constant 0 : index
    %c0_28 = arith.constant 0 : index
    %68 = vector.load %arg7[%c0_27, %c0_28] : memref<288x256xbf16, #tpu.memory_space<vmem>>, vector<288x256xbf16>
    %cst_29 = arith.constant dense<0.000000e+00> : vector<32x256xf32>
    %69 = tpu.matmul %67, %68, %cst_29 {dimension_numbers = #tpu.dot_dimension_numbers<[1], [0], [0], [1], [0, 0, 1, 1], [], []>} : vector<32x288xbf16>, vector<288x256xbf16>, vector<32x256xf32> -> vector<32x256xf32>
    %c0_30 = arith.constant 0 : index
    %c0_31 = arith.constant 0 : index
    %70 = vector.load %arg3[%c0_30, %c0_31] : memref<32x1xf32, #tpu.memory_space<vmem>>, vector<32x1xf32>
    %71 = vector.broadcast %70 : vector<32x1xf32> to vector<32x256xf32>
    %72 = arith.addf %69, %71 : vector<32x256xf32>
    %cst_32 = arith.constant 0.000000e+00 : f32
    %73 = vector.broadcast %cst_32 : f32 to vector<32x256xf32>
    %74 = arith.maximumf %72, %73 : vector<32x256xf32>
    %75 = arith.truncf %74 : vector<32x256xf32> to vector<32x256xbf16>
    %cst_33 = arith.constant 0.000000e+00 : bf16
    %76 = vector.broadcast %cst_33 : bf16 to vector<32x1xbf16>
    %77 = vector.extract_strided_slice %75 {offsets = [0, 0], sizes = [32, 255], strides = [1, 1]} : vector<32x256xbf16> to vector<32x255xbf16>
    %78 = tpu.concatenate %76, %77 in 1 : vector<32x1xbf16>, vector<32x255xbf16> -> vector<32x256xbf16>
    %cst_34 = arith.constant 0.000000e+00 : f32
    %79 = arith.truncf %cst_34 : f32 to bf16
    %80 = vector.shape_cast %18 : vector<1x256xi1> to vector<1x256xi1>
    %81 = vector.broadcast %80 : vector<1x256xi1> to vector<32x256xi1>
    %82 = vector.broadcast %79 : bf16 to vector<32x256xbf16>
    %83 = arith.select %81, %78, %82 : vector<32x256xi1>, vector<32x256xbf16>
    %cst_35 = arith.constant 0.000000e+00 : bf16
    %84 = vector.broadcast %cst_35 : bf16 to vector<32x1xbf16>
    %85 = vector.extract_strided_slice %75 {offsets = [0, 1], sizes = [32, 255], strides = [1, 1]} : vector<32x256xbf16> to vector<32x255xbf16>
    %86 = tpu.concatenate %85, %84 in 1 : vector<32x255xbf16>, vector<32x1xbf16> -> vector<32x256xbf16>
    %cst_36 = arith.constant 0.000000e+00 : f32
    %87 = arith.truncf %cst_36 : f32 to bf16
    %88 = vector.shape_cast %20 : vector<1x256xi1> to vector<1x256xi1>
    %89 = vector.broadcast %88 : vector<1x256xi1> to vector<32x256xi1>
    %90 = vector.broadcast %87 : bf16 to vector<32x256xbf16>
    %91 = arith.select %89, %86, %90 : vector<32x256xi1>, vector<32x256xbf16>
    %cst_37 = arith.constant 0.000000e+00 : bf16
    %92 = vector.broadcast %cst_37 : bf16 to vector<32x16xbf16>
    %93 = vector.extract_strided_slice %83 {offsets = [0, 0], sizes = [32, 240], strides = [1, 1]} : vector<32x256xbf16> to vector<32x240xbf16>
    %94 = tpu.concatenate %92, %93 in 1 : vector<32x16xbf16>, vector<32x240xbf16> -> vector<32x256xbf16>
    %c0_38 = arith.constant 0 : index
    %c0_39 = arith.constant 0 : index
    %95 = vector.load %arg7[%c0_38, %c0_39] : memref<288x256xbf16, #tpu.memory_space<vmem>>, vector<32x256xbf16>
    tpu.vector_store %arg7[%c0_38, %c0_39], %94 {strides = array<i32>} : memref<288x256xbf16, #tpu.memory_space<vmem>>, vector<32x256xbf16>,
    %cst_40 = arith.constant 0.000000e+00 : bf16
    %96 = vector.broadcast %cst_40 : bf16 to vector<32x16xbf16>
    %97 = vector.extract_strided_slice %75 {offsets = [0, 0], sizes = [32, 240], strides = [1, 1]} : vector<32x256xbf16> to vector<32x240xbf16>
    %98 = tpu.concatenate %96, %97 in 1 : vector<32x16xbf16>, vector<32x240xbf16> -> vector<32x256xbf16>
    %c32_41 = arith.constant 32 : index
    %c0_42 = arith.constant 0 : index
    %99 = vector.load %arg7[%c32_41, %c0_42] : memref<288x256xbf16, #tpu.memory_space<vmem>>, vector<32x256xbf16>
    tpu.vector_store %arg7[%c32_41, %c0_42], %98 {strides = array<i32>} : memref<288x256xbf16, #tpu.memory_space<vmem>>, vector<32x256xbf16>,
    %cst_43 = arith.constant 0.000000e+00 : bf16
    %100 = vector.broadcast %cst_43 : bf16 to vector<32x16xbf16>
    %101 = vector.extract_strided_slice %91 {offsets = [0, 0], sizes = [32, 240], strides = [1, 1]} : vector<32x256xbf16> to vector<32x240xbf16>
    %102 = tpu.concatenate %100, %101 in 1 : vector<32x16xbf16>, vector<32x240xbf16> -> vector<32x256xbf16>
    %c64_44 = arith.constant 64 : index
    %c0_45 = arith.constant 0 : index
    %103 = vector.load %arg7[%c64_44, %c0_45] : memref<288x256xbf16, #tpu.memory_space<vmem>>, vector<32x256xbf16>
    tpu.vector_store %arg7[%c64_44, %c0_45], %102 {strides = array<i32>} : memref<288x256xbf16, #tpu.memory_space<vmem>>, vector<32x256xbf16>,
    %c96_46 = arith.constant 96 : index
    %c0_47 = arith.constant 0 : index
    %104 = vector.load %arg7[%c96_46, %c0_47] : memref<288x256xbf16, #tpu.memory_space<vmem>>, vector<32x256xbf16>
    tpu.vector_store %arg7[%c96_46, %c0_47], %83 {strides = array<i32>} : memref<288x256xbf16, #tpu.memory_space<vmem>>, vector<32x256xbf16>,
    %c128_48 = arith.constant 128 : index
    %c0_49 = arith.constant 0 : index
    %105 = vector.load %arg7[%c128_48, %c0_49] : memref<288x256xbf16, #tpu.memory_space<vmem>>, vector<32x256xbf16>
    tpu.vector_store %arg7[%c128_48, %c0_49], %75 {strides = array<i32>} : memref<288x256xbf16, #tpu.memory_space<vmem>>, vector<32x256xbf16>,
    %c160_50 = arith.constant 160 : index
    %c0_51 = arith.constant 0 : index
    %106 = vector.load %arg7[%c160_50, %c0_51] : memref<288x256xbf16, #tpu.memory_space<vmem>>, vector<32x256xbf16>
    tpu.vector_store %arg7[%c160_50, %c0_51], %91 {strides = array<i32>} : memref<288x256xbf16, #tpu.memory_space<vmem>>, vector<32x256xbf16>,
    %cst_52 = arith.constant 0.000000e+00 : bf16
    %107 = vector.broadcast %cst_52 : bf16 to vector<32x16xbf16>
    %108 = vector.extract_strided_slice %83 {offsets = [0, 16], sizes = [32, 240], strides = [1, 1]} : vector<32x256xbf16> to vector<32x240xbf16>
    %109 = tpu.concatenate %108, %107 in 1 : vector<32x240xbf16>, vector<32x16xbf16> -> vector<32x256xbf16>
    %c192_53 = arith.constant 192 : index
    %c0_54 = arith.constant 0 : index
    %110 = vector.load %arg7[%c192_53, %c0_54] : memref<288x256xbf16, #tpu.memory_space<vmem>>, vector<32x256xbf16>
    tpu.vector_store %arg7[%c192_53, %c0_54], %109 {strides = array<i32>} : memref<288x256xbf16, #tpu.memory_space<vmem>>, vector<32x256xbf16>,
    %cst_55 = arith.constant 0.000000e+00 : bf16
    %111 = vector.broadcast %cst_55 : bf16 to vector<32x16xbf16>
    %112 = vector.extract_strided_slice %75 {offsets = [0, 16], sizes = [32, 240], strides = [1, 1]} : vector<32x256xbf16> to vector<32x240xbf16>
    %113 = tpu.concatenate %112, %111 in 1 : vector<32x240xbf16>, vector<32x16xbf16> -> vector<32x256xbf16>
    %c224_56 = arith.constant 224 : index
    %c0_57 = arith.constant 0 : index
    %114 = vector.load %arg7[%c224_56, %c0_57] : memref<288x256xbf16, #tpu.memory_space<vmem>>, vector<32x256xbf16>
    tpu.vector_store %arg7[%c224_56, %c0_57], %113 {strides = array<i32>} : memref<288x256xbf16, #tpu.memory_space<vmem>>, vector<32x256xbf16>,
    %cst_58 = arith.constant 0.000000e+00 : bf16
    %115 = vector.broadcast %cst_58 : bf16 to vector<32x16xbf16>
    %116 = vector.extract_strided_slice %91 {offsets = [0, 16], sizes = [32, 240], strides = [1, 1]} : vector<32x256xbf16> to vector<32x240xbf16>
    %117 = tpu.concatenate %116, %115 in 1 : vector<32x240xbf16>, vector<32x16xbf16> -> vector<32x256xbf16>
    %c256_59 = arith.constant 256 : index
    %c0_60 = arith.constant 0 : index
    %118 = vector.load %arg7[%c256_59, %c0_60] : memref<288x256xbf16, #tpu.memory_space<vmem>>, vector<32x256xbf16>
    tpu.vector_store %arg7[%c256_59, %c0_60], %117 {strides = array<i32>} : memref<288x256xbf16, #tpu.memory_space<vmem>>, vector<32x256xbf16>,
    %c0_61 = arith.constant 0 : index
    %c0_62 = arith.constant 0 : index
    %119 = vector.load %arg4[%c0_61, %c0_62] : memref<32x288xbf16, #tpu.memory_space<vmem>>, vector<32x288xbf16>
    %c0_63 = arith.constant 0 : index
    %c0_64 = arith.constant 0 : index
    %120 = vector.load %arg7[%c0_63, %c0_64] : memref<288x256xbf16, #tpu.memory_space<vmem>>, vector<288x256xbf16>
    %cst_65 = arith.constant dense<0.000000e+00> : vector<32x256xf32>
    %121 = tpu.matmul %119, %120, %cst_65 {dimension_numbers = #tpu.dot_dimension_numbers<[1], [0], [0], [1], [0, 0, 1, 1], [], []>} : vector<32x288xbf16>, vector<288x256xbf16>, vector<32x256xf32> -> vector<32x256xf32>
    %c0_66 = arith.constant 0 : index
    %c0_67 = arith.constant 0 : index
    %122 = vector.load %arg5[%c0_66, %c0_67] : memref<32x1xf32, #tpu.memory_space<vmem>>, vector<32x1xf32>
    %123 = vector.broadcast %122 : vector<32x1xf32> to vector<32x256xf32>
    %124 = arith.addf %121, %123 : vector<32x256xf32>
    %c0_68 = arith.constant 0 : index
    %c0_69 = arith.constant 0 : index
    %c0_70 = arith.constant 0 : index
    %125 = vector.load %arg1[%c0_68, %c0_69, %c0_70] : memref<1x32x256xf32, #tpu.memory_space<vmem>>, vector<1x32x256xf32>
    %126 = vector.shape_cast %125 : vector<1x32x256xf32> to vector<32x256xf32>
    %127 = arith.addf %126, %124 : vector<32x256xf32>
    %c0_71 = arith.constant 0 : index
    %c0_72 = arith.constant 0 : index
    %c0_73 = arith.constant 0 : index
    %128 = vector.load %arg6[%c0_71, %c0_72, %c0_73] : memref<1x32x256xf32, #tpu.memory_space<vmem>>, vector<1x32x256xf32>
    %129 = vector.shape_cast %128 : vector<1x32x256xf32> to vector<32x256xf32>
    %130 = vector.shape_cast %127 : vector<32x256xf32> to vector<1x32x256xf32>
    tpu.vector_store %arg6[%c0_71, %c0_72, %c0_73], %130 {strides = array<i32>} : memref<1x32x256xf32, #tpu.memory_space<vmem>>, vector<1x32x256xf32>,
    return
  }
  func.func @transform_0(%arg0: i32) -> (i32, i32, i32) {
    %c0_i32 = arith.constant 0 : i32
    %c0_i32_0 = arith.constant 0 : i32
    %c0_i32_1 = arith.constant 0 : i32
    return %arg0, %c0_i32, %c0_i32_0 : i32, i32, i32
  }
  func.func @transform_1(%arg0: i32) -> (i32, i32) {
    %c0_i32 = arith.constant 0 : i32
    %c0_i32_0 = arith.constant 0 : i32
    %c0_i32_1 = arith.constant 0 : i32
    return %c0_i32, %c0_i32_0 : i32, i32
  }
  func.func @transform_2(%arg0: i32) -> (i32, i32) {
    %c0_i32 = arith.constant 0 : i32
    %c0_i32_0 = arith.constant 0 : i32
    %c0_i32_1 = arith.constant 0 : i32
    return %c0_i32, %c0_i32_0 : i32, i32
  }
  func.func @transform_3(%arg0: i32) -> (i32, i32) {
    %c0_i32 = arith.constant 0 : i32
    %c0_i32_0 = arith.constant 0 : i32
    %c0_i32_1 = arith.constant 0 : i32
    return %c0_i32, %c0_i32_0 : i32, i32
  }
  func.func @transform_4(%arg0: i32) -> (i32, i32) {
    %c0_i32 = arith.constant 0 : i32
    %c0_i32_0 = arith.constant 0 : i32
    %c0_i32_1 = arith.constant 0 : i32
    return %c0_i32, %c0_i32_0 : i32, i32
  }
  func.func @transform_5(%arg0: i32) -> (i32, i32, i32) {
    %c0_i32 = arith.constant 0 : i32
    %c0_i32_0 = arith.constant 0 : i32
    %c0_i32_1 = arith.constant 0 : i32
    return %arg0, %c0_i32, %c0_i32_0 : i32, i32, i32
  }
}

</mosaic_0001>

<bundles_post_ra>
// kernel: squeeze.4
= control target key start
LH: loop header
LB: loop body
LE: loop exit
PB: predicated region body
PF: predicated region fallthrough
CT: control target
= control target key end

     0   :  { %vm15_vm0 = vcmask 261120   ;;  %s59_s0 = inlined_call_operand.vmem [shape: f32[32,3,3], index: 0, kind: input, shape index: {}]   ;;  %s60_s1 = inlined_call_operand.vmem [shape: f32[32,9], index: 1, kind: output, shape index: {}]  }
   0x1   :  { %v27_v0 = vld [vmem:[%s59_s0 + $0x8] sm:$0xf]  ;;  %v28_v1 = vld [vmem:[%s59_s0 + $0x4] sm:$0xf]  ;;  %v12_v2 = vld [vmem:[%s59_s0] sm:$0xf] }
   0x2   :  { %7 = vst [vmem:[#allocation0] sm:$0xf] %v27_v0 }
   0x3   :  { %11 = vst [vmem:[#allocation0 + $0x10] sm:$0xf] %v28_v1 }
   0x4   :  { %13 = vst [vmem:[#allocation0 + $0x8] sm:$0xf] %v12_v2 }
   0x9   :  { %v23_v3 = vld [vmem:[#allocation0] sm:$0x7]  }
   0xa   :  { %v18_v4 = vld [vmem:[#allocation0 + $0x10] sm:$0x7]   ;;  %30 = vst.msk [vmem:[%s60_s1 + $0x6] sm:$0x7] %vm15_vm0, %v23_v3  }
   0xb   :  { %v14_v5 = vld [vmem:[#allocation0 + $0x8] sm:$0x7]   ;;  %29 = vst.msk [vmem:[%s60_s1 + $0x3] sm:$0x7] %vm15_vm0, %v18_v4  }
   0xc   :  { %16 = vst.msk [vmem:[%s60_s1] sm:$0x7] %vm15_vm0, %v14_v5  }

// kernel: resblock_pallas.1
= control target key start
LH: loop header
LB: loop body
LE: loop exit
PB: predicated region body
PF: predicated region fallthrough
CT: control target
= control target key end

     0   :  { %s2376_s18 = smov 0   ;;  %s2856_s0 = inlined_call_operand.vmem [shape: f32[2,32,256], index: 0, kind: input, shape index: {}]   ;;  %s2857_s1 = inlined_call_operand.vmem [shape: bf16[32,288], index: 1, kind: input, shape index: {}]   ;;  %s2858_s2 = inlined_call_operand.vmem [shape: f32[32,1], index: 2, kind: input, shape index: {}]   ;;  %s2859_s3 = inlined_call_operand.vmem [shape: bf16[32,288], index: 3, kind: input, shape index: {}]   ;;  %s2860_s4 = inlined_call_operand.vmem [shape: f32[32,1], index: 4, kind: input, shape index: {}]   ;;  %s2861_s5 = inlined_call_operand.vmem [shape: f32[2,32,256], index: 5, kind: output, shape index: {}]  }
   0x1 LB: > { %s1868_s19 = sadd.s32 4294967295, %s2339_s18   ;;  %p1872_p0 = scmp.ge.s32.totalorder %s2339_s18, 1  ;;  %s2339_s18 = sphi %s2376_s18, %s15_s18  }
   0x2   : > { %p187_p1 = scmp.lt.s32.totalorder %s2339_s18, 3 }
   0x4   : > { %p188_p2 = pnand %p1872_p0, %p187_p1 }
   0x5   : > { %p215_p3 = scmp.lt.s32.totalorder (!%p188_p2), %s1868_s19, 1  ;;  %s2341_s24 = smov (!%p188_p2), 127  }
   0x6   : > { %191 = sbr.rel (%p188_p2) target bundleno = 994 (0x3e2), region = 40  ;;  %s2342_s25 = smov (!%p188_p2), 1  }
   0x7   : > { %s2343_s26 = smov (!%p188_p2), 16   ;;  %s2344_s27 = smov (!%p188_p2), 112  }
   0xb   : > { %s2875_s19 = smov (!%p215_p3, %s1868_s19), 1  ;;  %v228_v24 = vlaneseq  ;;  %v2345_v25 = vmov 0   ;;  %vm295_vm6 = vcmask 7168  }
   0xc   : > { %s2223_s20 = sshll.u32 %s2875_s19, 6  ;;  %2332 = vset.pattern.permute.xlu1 %v2345_v25  ;;  %2331 = vset.pattern.permute.xlu0 %v2345_v25  ;;  %v318_v36 = vunpack.c.l.b16 %v2345_v25  ;;  %v319_v37 = vunpack.c.h.b16 %v2345_v25 }
   0xd   : > { %s2392_s23 = scalar_lea.vmem %s2856_s0, %s2223_s20  ;;  %2330 = vset.pattern.permute.xlu2 %v2345_v25  ;;  %v229_v26 = vand.u32 127, %v228_v24  ;;  %s2836_s10 = scalar_lea.vmem %s2861_s5, %s2223_s20 }
   0xe   : > { %v263_v0 = vld [vmem:[%s2392_s23 + $0x20] sm:$0xff]  ;;  %v264_v1 = vld [vmem:[%s2392_s23 + $0x28] sm:$0xff]  ;;  %v265_v2 = vld [vmem:[%s2392_s23 + $0x30] sm:$0xff] }
   0xf   : > { %v266_v3 = vld [vmem:[%s2392_s23 + $0x38] sm:$0xff]  ;;  %v269_v4 = vpack.c.bf16 %v264_v1, %v263_v0  ;;  %v259_v5 = vld [vmem:[%s2392_s23] sm:$0xff]  ;;  %v260_v6 = vld [vmem:[%s2392_s23 + $0x8] sm:$0xff]  ;;  %v230_v27 = vadd.s32 128, %v229_v26  ;;  %v235_v28 = vand.u32 15, %v229_v26 }
  0x10   : > { %v270_v7 = vpack.c.bf16 %v266_v3, %v265_v2  ;;  %v261_v8 = vld [vmem:[%s2392_s23 + $0x10] sm:$0xff]  ;;  %v262_v9 = vld [vmem:[%s2392_s23 + $0x18] sm:$0xff]  ;;  %v267_v10 = vpack.c.bf16 %v260_v6, %v259_v5 }
  0x11   : > { %v279_v11 = vunpack.c.l.b16 %v269_v4  ;;  %520 = vst [vmem:[#allocation2 + $0x90] sm:$0xff] %v269_v4  ;;  %v268_v12 = vpack.c.bf16 %v262_v9, %v261_v8  ;;  %v280_v18 = vunpack.c.h.b16 %v269_v4  ;;  %v242_v29 = vand.u32 15, %v230_v27 }
  0x12   : > { %v281_v13 = vunpack.c.l.b16 %v270_v7  ;;  %521 = vst [vmem:[#allocation2 + $0x98] sm:$0xff] %v270_v7  ;;  %v275_v14 = vunpack.c.l.b16 %v267_v10  ;;  %v282_v19 = vunpack.c.h.b16 %v270_v7  ;;  %v276_v20 = vunpack.c.h.b16 %v267_v10 }
  0x13   : > { %v277_v15 = vunpack.c.l.b16 %v268_v12  ;;  %518 = vst [vmem:[#allocation2 + $0x80] sm:$0xff] %v267_v10  ;;  %v278_v21 = vunpack.c.h.b16 %v268_v12  ;;  %vm2418_vm0 = vcmp.lt.s32.totalorder %v235_v28, 15  ;;  %vm2422_vm1 = vcmp.lt.s32.totalorder %v242_v29, 15 }
  0x14   : > { %v285_v16 = vpack.c.b16 %v281_v13, %v279_v11  ;;  %519 = vst [vmem:[#allocation2 + $0x88] sm:$0xff] %v268_v12  ;;  %v286_v22 = vpack.c.b16 %v282_v19, %v280_v18  ;;  %vm255_vm2 = vcmp.gt.s32.totalorder %v235_v28, 0  ;;  %vm256_vm3 = vcmp.gt.s32.totalorder %v242_v29, 0  ;;  %vm358_vm5 = vmpackc.low %vm2422_vm1, %vm2418_vm0 }
  0x15   : > { %v283_v17 = vpack.c.b16 %v277_v15, %v275_v14  ;;  %v284_v23 = vpack.c.b16 %v278_v21, %v276_v20  ;;  %vm312_vm4 = vmpackc.low %vm256_vm3, %vm255_vm2  ;;  %v359_v42 = vsel %vm358_vm5, 65537, %v2345_v25  ;;  %vm342_vm1 = vcmask 1039360  }
  0x16   : > { %338 = vrot.lane.b32.xlu0 %v285_v16, %s2341_s24  ;;  %291 = vrot.lane.b32.xlu2 %v285_v16, %s2342_s25  ;;  %v313_v33 = vsel %vm312_vm4, 65537, %v2345_v25  ;;  %v360_v46 = vperm.slane %v359_v42, 0  ;;  %v361_v50 = vperm.slane %v359_v42, 4  ;;  %vm550_vm4 = vcmask 916480  }
  0x17   : > { %334 = vrot.lane.b32.xlu1 %v283_v17, %s2341_s24  ;;  %v314_v34 = vperm.slane %v313_v33, 0  ;;  %v315_v35 = vperm.slane %v313_v33, 4  ;;  %vm392_vm5 = vcmask 130048  }
  0x18   : > { %v362_v56 = vunpack.c.l.b16 %v360_v46  ;;  %v363_v57 = vunpack.c.h.b16 %v360_v46  ;;  %v369_v61 = vunpack.c.l.b16 %v361_v50  ;;  %v370_v62 = vunpack.c.h.b16 %v361_v50 }
  0x19   : > { %v316_v38 = vunpack.c.l.b16 %v314_v34  ;;  %v317_v39 = vunpack.c.h.b16 %v314_v34  ;;  %v323_v40 = vunpack.c.l.b16 %v315_v35  ;;  %v324_v41 = vunpack.c.h.b16 %v315_v35 }
  0x1a   : > { %vm366_vm13 = vcmp.ne.s32.totalorder %v362_v56, %v318_v36  ;;  %vm367_vm14 = vcmp.ne.s32.totalorder %v363_v57, %v319_v37  ;;  %vm373_vm15 = vcmp.ne.s32.totalorder %v369_v61, %v318_v36  ;;  %vm374_vm0 = vcmp.ne.s32.totalorder %v370_v62, %v319_v37 }
  0x1b   : > { %vm320_vm7 = vcmp.ne.s32.totalorder %v316_v38, %v318_v36  ;;  %vm321_vm8 = vcmp.ne.s32.totalorder %v317_v39, %v319_v37  ;;  %vm327_vm9 = vcmp.ne.s32.totalorder %v323_v40, %v318_v36  ;;  %vm328_vm10 = vcmp.ne.s32.totalorder %v324_v41, %v319_v37  ;;  %vm2452_vm2 = vmpackc.low %vm367_vm14, %vm366_vm13 }
  0x1c   : > { %vm2431_vm11 = vmpackc.low %vm321_vm8, %vm320_vm7  ;;  %vm930_vm7 = vcmask 261120  }
  0x1d   : > { %vm2439_vm12 = vmpackc.low %vm328_vm10, %vm327_vm9 }
  0x1e   : > { %340 = vrot.lane.b32.xlu0 %v286_v22, %s2341_s24  ;;  %293 = vrot.lane.b32.xlu2 %v286_v22, %s2342_s25  ;;  %vm2456_vm3 = vmpackc.low %vm374_vm0, %vm373_vm15 }
  0x1f   : > { %336 = vrot.lane.b32.xlu1 %v284_v23, %s2341_s24 }
  0x26   : > { %287 = vrot.lane.b32.xlu0 %v283_v17, %s2342_s25  ;;  %424 = vrot.lane.b32.xlu2 %v284_v23, %s2343_s26 }
  0x27   : > { %289 = vrot.lane.b32.xlu1 %v284_v23, %s2342_s25 }
  0x2e   : > { %586 = vrot.lane.b32.xlu2 %v286_v22, %s2344_s27  ;;  %426 = vrot.lane.b32.xlu0 %v285_v16, %s2343_s26 }
  0x2f   : > { %428 = vrot.lane.b32.xlu1 %v286_v22, %s2343_s26 }
  0x36   : > { %580 = vrot.lane.b32.xlu2 %v283_v17, %s2344_s27  ;;  %582 = vrot.lane.b32.xlu0 %v284_v23, %s2344_s27 }
  0x37   : > { %422 = vrot.lane.b32.xlu1 %v283_v17, %s2343_s26 }
  0x3f   : > { %584 = vrot.lane.b32.xlu1 %v285_v16, %s2344_s27 }
  0x70   : > { %v292_v32 = vpop.permute.xlu2 %291 }
  0x71   : > { %v306_v43 = vsel %vm295_vm6, 0, %v292_v32 }
  0x72   : > { %v2437_v47 = vsel %vm2431_vm11, %v306_v43, 0 }
  0x73   : > { %v502_v51 = vunpack.c.l.b16 %v2437_v47  ;;  %v504_v52 = vunpack.c.h.b16 %v2437_v47 }
  0x78   : > { %v294_v45 = vpop.permute.xlu2 %293 }
  0x79   : > { %v297_v49 = vsel %vm295_vm6, %v292_v32, %v294_v45 }
  0x7a   : > { %v2448_v53 = vsel %vm2439_vm12, %v297_v49, 0 }
  0x7b   : > { %v503_v54 = vunpack.c.l.b16 %v2448_v53  ;;  %v505_v55 = vunpack.c.h.b16 %v2448_v53 }
  0x7d   : > { %v508_v58 = vpack.c.b16 %v503_v54, %v502_v51  ;;  %v509_v59 = vpack.c.b16 %v505_v55, %v504_v52 }
  0x7f   : > { %516 = vst [vmem:[#allocation2 + $0x70] sm:$0xff] %v508_v58 }
  0x80   : > { %517 = vst [vmem:[#allocation2 + $0x78] sm:$0xff] %v509_v59  ;;  %v425_v51 = vpop.permute.xlu2 %424 }
  0x86   : > { %v1959_v3 = vld [vmem:[#allocation2 + $0x70] sm:$0xf]  ;;  %v2245_v4 = vld [vmem:[#allocation2 + $0x74] sm:$0xf] }
  0x87   : > { %v2246_v8 = vld [vmem:[#allocation2 + $0x74] sm:$0xf0]  ;;  %v1961_v9 = vld [vmem:[#allocation2 + $0x78] sm:$0xf0] }
  0x88   : > { %v339_v60 = vpop.permute.xlu0 %338  ;;  %v1960_v20 = vor.u32 %v2246_v8, %v1959_v3  ;;  %v1964_v21 = vor.u32 %v2245_v4, %v1961_v9  ;;  %v587_v54 = vpop.permute.xlu2 %586 }
  0x89   : > { %v335_v63 = vpop.permute.xlu1 %334 }
  0x8a   : > { %937 = vmatpush.bf16.msra.mxu0 %v1960_v20  ;;  %994 = vmatpush.bf16.msra.mxu3 %v1964_v21 }
  0x90   : > { %v341_v2 = vpop.permute.xlu0 %340 }
  0x91   : > { %v344_v5 = vsel %vm342_vm1, %v339_v60, %v341_v2  ;;  %v352_v6 = vsel %vm342_vm1, %v341_v2, 0  ;;  %v337_v7 = vpop.permute.xlu1 %336 }
  0x92   : > { %v378_v10 = vsel %vm2452_vm2, %v344_v5, 0  ;;  %v379_v11 = vsel %vm2456_vm3, %v352_v6, 0  ;;  %v343_v12 = vsel %vm342_vm1, %v335_v63, %v337_v7  ;;  %v349_v13 = vsel %vm342_vm1, %v337_v7, 0 }
  0x93   : > { %v526_v14 = vunpack.c.l.b16 %v378_v10  ;;  %v527_v15 = vunpack.c.l.b16 %v379_v11  ;;  %v528_v16 = vunpack.c.h.b16 %v378_v10  ;;  %v529_v17 = vunpack.c.h.b16 %v379_v11  ;;  %466 = vrot.lane.b32.xlu2 %v378_v10, %s2343_s26  ;;  %468 = vrot.lane.b32.xlu0 %v379_v11, %s2343_s26 }
  0x94   : > { %v376_v18 = vsel %vm2452_vm2, %v343_v12, 0  ;;  %v377_v19 = vsel %vm2456_vm3, %v349_v13, 0  ;;  %v593_v7 = vsel %vm550_vm4, %v587_v54, 0 }
  0x95   : > { %v532_v22 = vpack.c.b16 %v527_v15, %v526_v14  ;;  %v533_v23 = vpack.c.b16 %v529_v17, %v528_v16  ;;  %v522_v24 = vunpack.c.l.b16 %v376_v18  ;;  %v523_v25 = vunpack.c.l.b16 %v377_v19  ;;  %462 = vrot.lane.b32.xlu1 %v376_v18, %s2343_s26 }
  0x96   : > { %v524_v26 = vunpack.c.h.b16 %v376_v18  ;;  %v525_v27 = vunpack.c.h.b16 %v377_v19  ;;  %v603_v12 = vunpack.c.h.b16 %v593_v7 }
  0x97   : > { %540 = vst [vmem:[#allocation2 + $0xb0] sm:$0xff] %v532_v22  ;;  %v530_v28 = vpack.c.b16 %v523_v25, %v522_v24 }
  0x98   : > { %541 = vst [vmem:[#allocation2 + $0xb8] sm:$0xff] %v533_v23  ;;  %v531_v29 = vpack.c.b16 %v525_v27, %v524_v26  ;;  %v288_v30 = vpop.permute.xlu0 %287 }
  0x99   : > { %538 = vst [vmem:[#allocation2 + $0xa0] sm:$0xff] %v530_v28  ;;  %v303_v31 = vsel %vm295_vm6, 0, %v288_v30  ;;  %v290_v32 = vpop.permute.xlu1 %289 }
  0x9a   : > { %539 = vst [vmem:[#allocation2 + $0xa8] sm:$0xff] %v531_v29  ;;  %v330_v33 = vsel %vm2431_vm11, %v303_v31, 0  ;;  %v296_v34 = vsel %vm295_vm6, %v288_v30, %v290_v32 }
  0x9b   : > { %622 = vrot.lane.b32.xlu0 %v379_v11, %s2344_s27  ;;  %464 = vrot.lane.b32.xlu2 %v377_v19, %s2343_s26  ;;  %v498_v35 = vunpack.c.l.b16 %v330_v33  ;;  %v500_v36 = vunpack.c.h.b16 %v330_v33  ;;  %v331_v37 = vsel %vm2439_vm12, %v296_v34, 0  ;;  %v601_v11 = vunpack.c.l.b16 %v593_v7 }
  0x9c   : > { %v499_v38 = vunpack.c.l.b16 %v331_v37  ;;  %v501_v39 = vunpack.c.h.b16 %v331_v37 }
  0x9d   : > { %618 = vrot.lane.b32.xlu1 %v377_v19, %s2344_s27 }
  0x9e   : > { %v506_v40 = vpack.c.b16 %v499_v38, %v498_v35  ;;  %v507_v41 = vpack.c.b16 %v501_v39, %v500_v36 }
  0xa0   : > { %514 = vst [vmem:[#allocation2 + $0x60] sm:$0xff] %v506_v40  ;;  %v427_v56 = vpop.permute.xlu0 %426 }
  0xa1   : > { %515 = vst [vmem:[#allocation2 + $0x68] sm:$0xff] %v507_v41  ;;  %v429_v52 = vpop.permute.xlu1 %428 }
  0xa2   : > { %v431_v58 = vsel %vm392_vm5, %v427_v56, %v429_v52 }
  0xa3   : > { %620 = vrot.lane.b32.xlu2 %v378_v10, %s2344_s27  ;;  %616 = vrot.lane.b32.xlu0 %v376_v18, %s2344_s27  ;;  %v443_v2 = vunpack.c.l.b16 %v431_v58  ;;  %v445_v4 = vunpack.c.h.b16 %v431_v58  ;;  %v581_v10 = vpop.permute.xlu2 %580 }
  0xa5   : > { %386 = vrot.lane.b32.xlu1 %v331_v37, %s2343_s26 }
  0xa7   : > { %v1951_v42 = vld [vmem:[#allocation2 + $0x60] sm:$0xf]  ;;  %v2243_v43 = vld [vmem:[#allocation2 + $0x64] sm:$0xf] }
  0xa8   : > { %v2244_v45 = vld [vmem:[#allocation2 + $0x64] sm:$0xf0]  ;;  %v1953_v46 = vld [vmem:[#allocation2 + $0x68] sm:$0xf0]  ;;  %v583_v14 = vpop.permute.xlu0 %582 }
  0xa9   : > { %v1952_v49 = vor.u32 %v2244_v45, %v1951_v42  ;;  %v1956_v50 = vor.u32 %v2243_v43, %v1953_v46  ;;  %v423_v55 = vpop.permute.xlu1 %422  ;;  %v588_v16 = vsel %vm550_vm4, %v581_v10, %v583_v14  ;;  %v591_v17 = vsel %vm550_vm4, %v583_v14, 0 }
  0xaa   : > { %v430_v57 = vsel %vm392_vm5, %v423_v55, %v425_v51  ;;  %v596_v20 = vunpack.c.l.b16 %v588_v16  ;;  %v597_v21 = vunpack.c.l.b16 %v591_v17  ;;  %v598_v22 = vunpack.c.h.b16 %v588_v16 }
  0xab   : > { %388 = vrot.lane.b32.xlu2 %v2437_v47, %s2343_s26  ;;  %390 = vrot.lane.b32.xlu0 %v2448_v53, %s2343_s26  ;;  %v439_v60 = vunpack.c.l.b16 %v430_v57  ;;  %v441_v62 = vunpack.c.h.b16 %v430_v57  ;;  %v599_v23 = vunpack.c.h.b16 %v591_v17 }
  0xac   : > { %938 = vmatpush.bf16.msra.mxu0 %v1952_v49  ;;  %995 = vmatpush.bf16.msra.mxu3 %v1956_v50  ;;  %v604_v26 = vpack.c.b16 %v597_v21, %v596_v20 }
  0xad   : > { %546 = vrot.lane.b32.xlu1 %v2437_v47, %s2344_s27  ;;  %v433_v47 = vsel %vm392_vm5, 0, %v423_v55  ;;  %v605_v27 = vpack.c.b16 %v599_v23, %v598_v22 }
  0xae   : > { %v438_v59 = vunpack.c.l.b16 %v433_v47  ;;  %v440_v61 = vunpack.c.h.b16 %v433_v47  ;;  %612 = vst [vmem:[#allocation2 + $0xe0] sm:$0xff] %v604_v26 }
  0xaf   : > { %613 = vst [vmem:[#allocation2 + $0xe8] sm:$0xff] %v605_v27 }
  0xb0   : > { %v446_v5 = vpack.c.b16 %v439_v60, %v438_v59  ;;  %v447_v6 = vpack.c.b16 %v441_v62, %v440_v61 }
  0xb1   : > { %v585_v13 = vpop.permute.xlu1 %584 }
  0xb2   : > { %454 = vst [vmem:[#allocation2 + $0x20] sm:$0xff] %v446_v5  ;;  %v589_v15 = vsel %vm550_vm4, %v585_v13, %v587_v54 }
  0xb3   : > { %548 = vrot.lane.b32.xlu2 %v2448_v53, %s2344_s27  ;;  %384 = vrot.lane.b32.xlu0 %v330_v33, %s2343_s26  ;;  %v435_v53 = vsel %vm392_vm5, 0, %v427_v56  ;;  %455 = vst [vmem:[#allocation2 + $0x28] sm:$0xff] %v447_v6  ;;  %v600_v18 = vunpack.c.l.b16 %v589_v15  ;;  %v602_v19 = vunpack.c.h.b16 %v589_v15 }
  0xb4   : > { %v442_v63 = vunpack.c.l.b16 %v435_v53  ;;  %v444_v3 = vunpack.c.h.b16 %v435_v53 }
  0xb5   : > { %544 = vrot.lane.b32.xlu1 %v331_v37, %s2344_s27  ;;  %v606_v24 = vpack.c.b16 %v601_v11, %v600_v18  ;;  %v607_v25 = vpack.c.b16 %v603_v12, %v602_v19  ;;  %v2015_v31 = vld [vmem:[#allocation2 + $0xe0] sm:$0xf] }
  0xb6   : > { %v448_v8 = vpack.c.b16 %v443_v2, %v442_v63  ;;  %v449_v9 = vpack.c.b16 %v445_v4, %v444_v3  ;;  %v2260_v32 = vld [vmem:[#allocation2 + $0xe4] sm:$0xf0] }
  0xb7   : > { %614 = vst [vmem:[#allocation2 + $0xf0] sm:$0xff] %v606_v24 }
  0xb8   : > { %456 = vst [vmem:[#allocation2 + $0x30] sm:$0xff] %v448_v8 }
  0xb9   : > { %457 = vst [vmem:[#allocation2 + $0x38] sm:$0xff] %v449_v9 }
  0xba   : > { %615 = vst [vmem:[#allocation2 + $0xf8] sm:$0xff] %v607_v25 }
  0xbb   : > { %542 = vrot.lane.b32.xlu0 %v330_v33, %s2344_s27  ;;  %v2016_v33 = vor.u32 %v2260_v32, %v2015_v31 }
  0xbe   : > { %v2023_v28 = vld [vmem:[#allocation2 + $0xf0] sm:$0xf] }
  0xc1   : > { %v2262_v29 = vld [vmem:[#allocation2 + $0xf4] sm:$0xf0] }
  0xc2   : > { %v2024_v30 = vor.u32 %v2262_v29, %v2023_v28  ;;  %v1927_v28 = vld [vmem:[#allocation2 + $0x30] sm:$0xf]  ;;  %v2238_v29 = vld [vmem:[#allocation2 + $0x34] sm:$0xf0] }
  0xc4   : > { %956 = vmatpush.bf16.msra.mxu1 %v2024_v30  ;;  %v1919_v30 = vld [vmem:[#allocation2 + $0x20] sm:$0xf] }
  0xc8   : > { %957 = vmatpush.bf16.msra.mxu1 %v2016_v33  ;;  %v2237_v33 = vld [vmem:[#allocation2 + $0x34] sm:$0xf] }
  0xed   : > { %v467_v34 = vpop.permute.xlu2 %466 }
  0xee   : > { %v475_v36 = vsel %vm392_vm5, 0, %v467_v34 }
  0xef   : > { %v482_v40 = vunpack.c.l.b16 %v475_v36  ;;  %v484_v41 = vunpack.c.h.b16 %v475_v36  ;;  %v2236_v36 = vld [vmem:[#allocation2 + $0x24] sm:$0xf0] }
  0xf5   : > { %v465_v35 = vpop.permute.xlu2 %464 }
  0xfd   : > { %v621_v38 = vpop.permute.xlu2 %620 }
 0x105   : > { %v469_v37 = vpop.permute.xlu0 %468  ;;  %v389_v3 = vpop.permute.xlu2 %388 }
 0x106   : > { %v471_v39 = vsel %vm392_vm5, %v467_v34, %v469_v37  ;;  %v1929_v34 = vld [vmem:[#allocation2 + $0x38] sm:$0xf0]  ;;  %v399_v37 = vsel %vm392_vm5, 0, %v389_v3 }
 0x107   : > { %v483_v42 = vunpack.c.l.b16 %v471_v39  ;;  %v485_v43 = vunpack.c.h.b16 %v471_v39  ;;  %v463_v45 = vpop.permute.xlu1 %462  ;;  %v1928_v39 = vor.u32 %v2238_v29, %v1927_v28 }
 0x108   : > { %v470_v46 = vsel %vm392_vm5, %v463_v45, %v465_v35  ;;  %v473_v49 = vsel %vm392_vm5, 0, %v463_v45  ;;  %v1921_v45 = vld [vmem:[#allocation2 + $0x28] sm:$0xf0] }
 0x109   : > { %v488_v50 = vpack.c.b16 %v483_v42, %v482_v40  ;;  %v489_v51 = vpack.c.b16 %v485_v43, %v484_v41  ;;  %v478_v52 = vunpack.c.l.b16 %v473_v49  ;;  %v479_v54 = vunpack.c.l.b16 %v470_v46  ;;  %v2235_v43 = vld [vmem:[#allocation2 + $0x24] sm:$0xf] }
 0x10a   : > { %v480_v55 = vunpack.c.h.b16 %v473_v49  ;;  %v481_v56 = vunpack.c.h.b16 %v470_v46  ;;  %v1932_v42 = vor.u32 %v2237_v33, %v1929_v34  ;;  %v1920_v49 = vor.u32 %v2236_v36, %v1919_v30 }
 0x10b   : > { %496 = vst [vmem:[#allocation2 + $0x50] sm:$0xff] %v488_v50  ;;  %v486_v57 = vpack.c.b16 %v479_v54, %v478_v52  ;;  %v406_v50 = vunpack.c.l.b16 %v399_v37 }
 0x10c   : > { %497 = vst [vmem:[#allocation2 + $0x58] sm:$0xff] %v489_v51  ;;  %v487_v47 = vpack.c.b16 %v481_v56, %v480_v55  ;;  %v408_v51 = vunpack.c.h.b16 %v399_v37 }
 0x10d   : > { %494 = vst [vmem:[#allocation2 + $0x40] sm:$0xff] %v486_v57  ;;  %v623_v58 = vpop.permute.xlu0 %622  ;;  %v549_v31 = vpop.permute.xlu2 %548 }
 0x10e   : > { %495 = vst [vmem:[#allocation2 + $0x48] sm:$0xff] %v487_v47  ;;  %v625_v53 = vsel %vm550_vm4, %v621_v38, %v623_v58  ;;  %v629_v59 = vsel %vm550_vm4, %v623_v58, 0  ;;  %v557_v40 = vsel %vm550_vm4, %v549_v31, 0  ;;  %v1924_v58 = vor.u32 %v2235_v43, %v1921_v45  ;;  %v1879_v45 = vld [vmem:[%s2857_s1] sm:$0xf] }
 0x10f   : > { %v636_v60 = vunpack.c.l.b16 %v625_v53  ;;  %v637_v61 = vunpack.c.l.b16 %v629_v59  ;;  %v638_v62 = vunpack.c.h.b16 %v625_v53  ;;  %v639_v63 = vunpack.c.h.b16 %v629_v59  ;;  %v619_v2 = vpop.permute.xlu1 %618 }
 0x110   : > { %v627_v10 = vsel %vm550_vm4, %v619_v2, 0  ;;  %v565_v56 = vunpack.c.l.b16 %v557_v40  ;;  %v567_v57 = vunpack.c.h.b16 %v557_v40 }
 0x111   : > { %v642_v4 = vpack.c.b16 %v637_v61, %v636_v60  ;;  %v643_v5 = vpack.c.b16 %v639_v63, %v638_v62  ;;  %v633_v19 = vunpack.c.l.b16 %v627_v10  ;;  %v635_v20 = vunpack.c.h.b16 %v627_v10  ;;  %v2261_v62 = vld [vmem:[#allocation2 + $0xf4] sm:$0xf]  ;;  %v2025_v63 = vld [vmem:[#allocation2 + $0xf8] sm:$0xf0] }
 0x112   : > { %v1943_v6 = vld [vmem:[#allocation2 + $0x50] sm:$0xf]  ;;  %v2241_v7 = vld [vmem:[#allocation2 + $0x54] sm:$0xf] }
 0x113   : > { %650 = vst [vmem:[#allocation2 + $0x110] sm:$0xff] %v642_v4  ;;  %v2242_v8 = vld [vmem:[#allocation2 + $0x54] sm:$0xf0]  ;;  %v1945_v9 = vld [vmem:[#allocation2 + $0x58] sm:$0xf0] }
 0x114   : > { %651 = vst [vmem:[#allocation2 + $0x118] sm:$0xff] %v643_v5  ;;  %v1944_v11 = vor.u32 %v2242_v8, %v1943_v6  ;;  %v1948_v12 = vor.u32 %v2241_v7, %v1945_v9  ;;  %v1935_v13 = vld [vmem:[#allocation2 + $0x40] sm:$0xf]  ;;  %v2239_v16 = vld [vmem:[#allocation2 + $0x44] sm:$0xf] }
 0x115   : > { %v617_v14 = vpop.permute.xlu0 %616  ;;  %v2240_v15 = vld [vmem:[#allocation2 + $0x44] sm:$0xf0]  ;;  %v1937_v17 = vld [vmem:[#allocation2 + $0x48] sm:$0xf0]  ;;  %v2227_v4 = vld [vmem:[%s2857_s1 + $0x10] sm:$0xf0] }
 0x116   : > { %v624_v18 = vsel %vm550_vm4, %v617_v14, %v619_v2  ;;  %939 = vmatpush.bf16.msra.mxu0 %v1944_v11  ;;  %996 = vmatpush.bf16.msra.mxu3 %v1948_v12  ;;  %v1936_v24 = vor.u32 %v2240_v15, %v1935_v13  ;;  %v1940_v25 = vor.u32 %v2239_v16, %v1937_v17  ;;  %v1887_v2 = vld [vmem:[%s2857_s1 + $0x8] sm:$0xf]  ;;  %v696_v5 = vld [vmem:[%s2858_s2] sm:$0xff]  ;;  %v2017_v16 = vld [vmem:[#allocation2 + $0xe8] sm:$0xf0] }
 0x117   : > { %v632_v21 = vunpack.c.l.b16 %v624_v18  ;;  %v634_v22 = vunpack.c.h.b16 %v624_v18  ;;  %v2514_v23 = vpop.permute.xlu1 %386  ;;  %702 = vperm.xlu1 %2332, %v696_v5   ;;  %v2028_v11 = vor.u32 %v2261_v62, %v2025_v63  ;;  %v2529_v12 = vor.u32 %v2227_v4, %v1887_v2  ;;  %v2259_v13 = vld [vmem:[#allocation2 + $0xe4] sm:$0xf]  ;;  %v698_v4 = vld [vmem:[%s2858_s2 + $0x10] sm:$0xff]  ;;  %v699_v5 = vld [vmem:[%s2858_s2 + $0x18] sm:$0xff] }
 0x118   : > { %712 = vperm.xlu2 %2330, %v698_v4   ;;  %717 = vperm.xlu0 %2331, %v699_v5  }
 0x119   : > { %v640_v26 = vpack.c.b16 %v633_v19, %v632_v21  ;;  %v641_v27 = vpack.c.b16 %v635_v20, %v634_v22 }
 0x11a   : > { %940 = vmatpush.bf16.msra.mxu0 %v1936_v24  ;;  %997 = vmatpush.bf16.msra.mxu3 %v1940_v25  ;;  %v2039_v32 = vld [vmem:[#allocation2 + $0x110] sm:$0xf]  ;;  %v2020_v25 = vor.u32 %v2259_v13, %v2017_v16  ;;  %v1993_v16 = vld [vmem:[#allocation2 + $0xb8] sm:$0xf0] }
 0x11b   : > { %648 = vst [vmem:[#allocation2 + $0x100] sm:$0xff] %v640_v26  ;;  %v2266_v35 = vld [vmem:[#allocation2 + $0x114] sm:$0xf0]  ;;  %v1991_v13 = vld [vmem:[#allocation2 + $0xb0] sm:$0xf] }
 0x11c   : > { %649 = vst [vmem:[#allocation2 + $0x108] sm:$0xff] %v641_v27  ;;  %v2040_v38 = vor.u32 %v2266_v35, %v2039_v32 }
 0x11d   : > { %v391_v41 = vpop.permute.xlu0 %390 }
 0x11e   : > { %981 = vmatpush.bf16.msra.mxu2 %v2040_v38  ;;  %v394_v46 = vsel %vm392_vm5, %v389_v3, %v391_v41  ;;  %941 = vmatpush.bf16.msra.mxu0 %v1928_v39 }
 0x11f   : > { %v407_v52 = vunpack.c.l.b16 %v394_v46  ;;  %v409_v54 = vunpack.c.h.b16 %v394_v46  ;;  %998 = vmatpush.bf16.msra.mxu3 %v1932_v42  ;;  %v547_v55 = vpop.permute.xlu1 %546  ;;  %v2226_v46 = vld [vmem:[%s2857_s1 + $0x8] sm:$0xf0] }
 0x120   : > { %v552_v47 = vsel %vm550_vm4, %v547_v55, %v549_v31 }
 0x121   : > { %v412_v53 = vpack.c.b16 %v407_v52, %v406_v50  ;;  %v413_v59 = vpack.c.b16 %v409_v54, %v408_v51  ;;  %v564_v60 = vunpack.c.l.b16 %v552_v47  ;;  %v566_v61 = vunpack.c.h.b16 %v552_v47  ;;  %v2265_v51 = vld [vmem:[#allocation2 + $0x114] sm:$0xf]  ;;  %v1899_v52 = vld [vmem:[%s2857_s1 + $0x20] sm:$0xf]  ;;  %v2230_v54 = vld [vmem:[%s2857_s1 + $0x28] sm:$0xf0] }
 0x122   : > { %942 = vmatpush.bf16.msra.mxu0 %v1920_v49  ;;  %v2031_v3 = vld [vmem:[#allocation2 + $0x100] sm:$0xf]  ;;  %v2550_v62 = vor.u32 %v2230_v54, %v1899_v52  ;;  %v2263_v63 = vld [vmem:[#allocation2 + $0x104] sm:$0xf] }
 0x123   : > { %420 = vst [vmem:[#allocation2 + $0x10] sm:$0xff] %v412_v53  ;;  %v570_v6 = vpack.c.b16 %v565_v56, %v564_v60  ;;  %v571_v7 = vpack.c.b16 %v567_v57, %v566_v61  ;;  %999 = vmatpush.bf16.msra.mxu3 %v1924_v58  ;;  %v2264_v8 = vld [vmem:[#allocation2 + $0x104] sm:$0xf0]  ;;  %v2041_v57 = vld [vmem:[#allocation2 + $0x118] sm:$0xf0]  ;;  %v1880_v61 = vor.u32 %v2226_v46, %v1879_v45 }
 0x124   : > { %421 = vst [vmem:[#allocation2 + $0x18] sm:$0xff] %v413_v59  ;;  %v2032_v9 = vor.u32 %v2264_v8, %v2031_v3  ;;  %v2044_v60 = vor.u32 %v2265_v51, %v2041_v57  ;;  %v2033_v2 = vld [vmem:[#allocation2 + $0x108] sm:$0xf0]  ;;  %v2228_v45 = vld [vmem:[%s2857_s1 + $0x1c] sm:$0xf] }
 0x125   : > { %578 = vst [vmem:[#allocation2 + $0xd0] sm:$0xff] %v570_v6  ;;  %v385_v10 = vpop.permute.xlu0 %384  ;;  %v2036_v3 = vor.u32 %v2263_v63, %v2033_v2  ;;  %v1893_v46 = vld [vmem:[%s2857_s1 + $0x24] sm:$0xf0] }
 0x126   : > { %579 = vst [vmem:[#allocation2 + $0xd8] sm:$0xff] %v571_v7  ;;  %v393_v14 = vsel %vm392_vm5, %v385_v10, %v2514_v23  ;;  %v397_v15 = vsel %vm392_vm5, 0, %v385_v10  ;;  %982 = vmatpush.bf16.msra.mxu2 %v2032_v9 }
 0x127   : > { %v402_v17 = vunpack.c.l.b16 %v397_v15  ;;  %v403_v18 = vunpack.c.l.b16 %v393_v14  ;;  %v404_v19 = vunpack.c.h.b16 %v397_v15  ;;  %v405_v20 = vunpack.c.h.b16 %v393_v14  ;;  %v545_v24 = vpop.permute.xlu1 %544  ;;  %v2254_v14 = vld [vmem:[#allocation2 + $0xb4] sm:$0xf0]  ;;  %v2253_v15 = vld [vmem:[#allocation2 + $0xb4] sm:$0xf] }
 0x128   : > { %v555_v29 = vsel %vm550_vm4, %v545_v24, 0 }
 0x129   : > { %v410_v21 = vpack.c.b16 %v403_v18, %v402_v17  ;;  %v411_v22 = vpack.c.b16 %v405_v20, %v404_v19  ;;  %2045 = vmatmul.msk.bf16.vlgmr.msra.gmra.mxu2 %vm930_vm7, %v2529_v12  ;;  %v561_v40 = vunpack.c.l.b16 %v555_v29  ;;  %v563_v41 = vunpack.c.h.b16 %v555_v29  ;;  %v1983_v19 = vld [vmem:[#allocation2 + $0xa0] sm:$0xf]  ;;  %v2251_v20 = vld [vmem:[#allocation2 + $0xa4] sm:$0xf]  ;;  %v1977_v29 = vld [vmem:[#allocation2 + $0x98] sm:$0xf0] }
 0x12a   : > { %1013 = vmatpush.bf16.msrb.mxu2 %v2028_v11  ;;  %v1911_v26 = vld [vmem:[#allocation2 + $0x10] sm:$0xf]  ;;  %v2233_v27 = vld [vmem:[#allocation2 + $0x14] sm:$0xf]  ;;  %v1992_v17 = vor.u32 %v2254_v14, %v1991_v13  ;;  %v1996_v18 = vor.u32 %v2253_v15, %v1993_v16 }
 0x12b   : > { %418 = vst [vmem:[#allocation2] sm:$0xff] %v410_v21  ;;  %v2234_v23 = vld [vmem:[#allocation2 + $0x14] sm:$0xf0]  ;;  %v1913_v28 = vld [vmem:[#allocation2 + $0x18] sm:$0xf0] }
 0x12c   : > { %419 = vst [vmem:[#allocation2 + $0x8] sm:$0xff] %v411_v22  ;;  %v1912_v30 = vor.u32 %v2234_v23, %v1911_v26  ;;  %v2007_v31 = vld [vmem:[#allocation2 + $0xd0] sm:$0xf]  ;;  %v1916_v32 = vor.u32 %v2233_v27, %v1913_v28  ;;  %v2257_v33 = vld [vmem:[#allocation2 + $0xd4] sm:$0xf] }
 0x12d   : > { %v543_v34 = vpop.permute.xlu0 %542  ;;  %v2258_v35 = vld [vmem:[#allocation2 + $0xd4] sm:$0xf0]  ;;  %v2009_v36 = vld [vmem:[#allocation2 + $0xd8] sm:$0xf0]  ;;  %v2252_v21 = vld [vmem:[#allocation2 + $0xa4] sm:$0xf0] }
 0x12e   : > { %1014 = vmatpush.bf16.msrb.mxu2 %v2020_v25  ;;  %v551_v37 = vsel %vm550_vm4, %v543_v34, %v545_v24  ;;  %943 = vmatpush.bf16.msra.mxu0 %v1912_v30  ;;  %v2008_v38 = vor.u32 %v2258_v35, %v2007_v31  ;;  %v2012_v39 = vor.u32 %v2257_v33, %v2009_v36  ;;  %v1985_v22 = vld [vmem:[#allocation2 + $0xa8] sm:$0xf0]  ;;  %v1891_v25 = vld [vmem:[%s2857_s1 + $0x18] sm:$0xf]  ;;  %v2229_v26 = vld [vmem:[%s2857_s1 + $0x20] sm:$0xf0] }
 0x12f   : > { %1000 = vmatpush.bf16.msra.mxu3 %v1916_v32  ;;  %v560_v42 = vunpack.c.l.b16 %v551_v37  ;;  %v562_v43 = vunpack.c.h.b16 %v551_v37  ;;  %v697_v24 = vld [vmem:[%s2858_s2 + $0x8] sm:$0xff]  ;;  %v1975_v27 = vld [vmem:[#allocation2 + $0x90] sm:$0xf]  ;;  %v2250_v23 = vld [vmem:[#allocation2 + $0x94] sm:$0xf0]  ;;  %v1984_v30 = vor.u32 %v2252_v21, %v1983_v19  ;;  %v1988_v31 = vor.u32 %v2251_v20, %v1985_v22 }
 0x130   : > { %958 = vmatpush.bf16.msra.mxu1 %v2008_v38  ;;  %v2249_v28 = vld [vmem:[#allocation2 + $0x94] sm:$0xf]  ;;  %707 = vperm.xlu2 %2330, %v697_v24   ;;  %v1892_v32 = vor.u32 %v2229_v26, %v1891_v25  ;;  %v1976_v33 = vor.u32 %v2250_v23, %v1975_v27  ;;  %v1967_v35 = vld [vmem:[#allocation2 + $0x80] sm:$0xf]  ;;  %v2248_v36 = vld [vmem:[#allocation2 + $0x84] sm:$0xf0] }
 0x131   : > { %v568_v49 = vpack.c.b16 %v561_v40, %v560_v42  ;;  %v569_v50 = vpack.c.b16 %v563_v41, %v562_v43  ;;  %v1980_v34 = vor.u32 %v2249_v28, %v1977_v29  ;;  %v2247_v37 = vld [vmem:[#allocation2 + $0x84] sm:$0xf]  ;;  %v1969_v38 = vld [vmem:[#allocation2 + $0x88] sm:$0xf0]  ;;  %v1881_v42 = vld [vmem:[%s2857_s1 + $0xc] sm:$0xf0] }
 0x132   : > { %1015 = vmatpush.bf16.msrb.mxu2 %v2012_v39  ;;  %v1903_v55 = vld [vmem:[#allocation2] sm:$0xf]  ;;  %v2231_v56 = vld [vmem:[#allocation2 + $0x4] sm:$0xf]  ;;  %v1968_v39 = vor.u32 %v2248_v36, %v1967_v35  ;;  %v1972_v40 = vor.u32 %v2247_v37, %v1969_v38 }
 0x133   : > { %576 = vst [vmem:[#allocation2 + $0xc0] sm:$0xff] %v568_v49  ;;  %v2232_v47 = vld [vmem:[#allocation2 + $0x4] sm:$0xf0]  ;;  %v1905_v58 = vld [vmem:[#allocation2 + $0x8] sm:$0xf0]  ;;  %v1896_v49 = vor.u32 %v2228_v45, %v1893_v46 }
 0x134   : > { %577 = vst [vmem:[#allocation2 + $0xc8] sm:$0xff] %v569_v50  ;;  %v1904_v53 = vor.u32 %v2232_v47, %v1903_v55  ;;  %v1908_v59 = vor.u32 %v2231_v56, %v1905_v58  ;;  %v2225_v41 = vld [vmem:[%s2857_s1 + $0x4] sm:$0xf] }
 0x135   : > { %v1884_v43 = vor.u32 %v2225_v41, %v1881_v42 }
 0x136   : > { %944 = vmatpush.bf16.msra.mxu0 %v1904_v53  ;;  %1001 = vmatpush.bf16.msra.mxu3 %v1908_v59 }
 0x139   : > { %945 = vmatmul.bf16.vlgmr.msra.gmra.mxu0 %v1880_v61  ;;  %2046 = vmatmul.msk.bf16.gmra.mxu2 %vm930_vm7, %v2550_v62 }
 0x13a   : > { %1038 = vmatpush.bf16.msrb.mxu0 %v2044_v60  ;;  %v1999_v6 = vld [vmem:[#allocation2 + $0xc0] sm:$0xf]  ;;  %v2255_v7 = vld [vmem:[#allocation2 + $0xc4] sm:$0xf]  ;;  %1002 = vmatmul.bf16.vlgmr.msra.gmra.mxu3 %v1880_v61 }
 0x13b   : > { %v2256_v8 = vld [vmem:[#allocation2 + $0xc4] sm:$0xf0]  ;;  %v2001_v9 = vld [vmem:[#allocation2 + $0xc8] sm:$0xf0] }
 0x13c   : > { %v2000_v10 = vor.u32 %v2256_v8, %v1999_v6  ;;  %v2004_v11 = vor.u32 %v2255_v7, %v2001_v9 }
 0x13e   : > { %1039 = vmatpush.bf16.msrb.mxu0 %v2036_v3  ;;  %959 = vmatpush.bf16.msra.mxu1 %v2000_v10 }
 0x13f   : > { %1016 = vmatpush.bf16.msrb.mxu2 %v2004_v11 }
 0x142   : > { %960 = vmatpush.bf16.msra.mxu1 %v1992_v17 }
 0x143   : > { %1017 = vmatpush.bf16.msrb.mxu2 %v1996_v18 }
 0x146   : > { %961 = vmatpush.bf16.msra.mxu1 %v1984_v30 }
 0x147   : > { %1018 = vmatpush.bf16.msrb.mxu2 %v1988_v31 }
 0x149   : > { %950 = vmatmul.bf16.gmra.mxu0 %v1892_v32 }
 0x14a   : > { %962 = vmatpush.bf16.msra.mxu1 %v1976_v33  ;;  %1007 = vmatmul.bf16.gmra.mxu3 %v1892_v32 }
 0x14b   : > { %1019 = vmatpush.bf16.msrb.mxu2 %v1980_v34 }
 0x14e   : > { %963 = vmatpush.bf16.msra.mxu1 %v1968_v39 }
 0x14f   : > { %1020 = vmatpush.bf16.msrb.mxu2 %v1972_v40 }
 0x151   : > { %964 = vmatmul.bf16.vlgmr.msra.gmra.mxu1 %v1884_v43 }
 0x152   : > { %1021 = vmatmul.bf16.vlgmr.msrb.gmra.mxu2 %v1884_v43 }
 0x159   : > { %2047 = vmatmul.msk.bf16.vlgmr.msrb.gmra.mxu0 %vm930_vm7, %v2529_v12 }
 0x161   : > { %969 = vmatmul.bf16.gmra.mxu1 %v1896_v49 }
 0x162   : > { %1026 = vmatmul.bf16.gmra.mxu2 %v1896_v49 }
 0x169   : > { %2048 = vmatmul.msk.bf16.gmra.mxu0 %vm930_vm7, %v2550_v62 }
 0x172   : > { %v713_v57 = vpop.permute.xlu2 %712 }
 0x189   : > { %v703_v47 = vpop.permute.xlu1 %702 }
 0x18a   : > { %v708_v3 = vpop.permute.xlu2 %707  ;;  %v718_v29 = vpop.permute.xlu0 %717 }
 0x1ac   : > { %v984_v50 = vpop.f32.mrf.mxu2 }
 0x1b4   : > { %v986_v52 = vpop.f32.mrf.mxu2 }
 0x1b6   : > { %v946_v51 = vpop.f32.mrf.mxu0 }
 0x1b7   : > { %v947_v60 = vadd.f32 %v946_v51, %v703_v47 }
 0x1bc   : > { %v989_v55 = vpop.f32.mrf.mxu2 }
 0x1bd   : > { %v1003_v56 = vpop.f32.mrf.mxu3 }
 0x1be   : > { %v948_v54 = vpop.f32.mrf.mxu0  ;;  %v1004_v61 = vadd.f32 %v1003_v56, %v703_v47 }
 0x1bf   : > { %v949_v8 = vadd.f32 %v948_v54, %v708_v3 }
 0x1c4   : > { %v991_v58 = vpop.f32.mrf.mxu2 }
 0x1c5   : > { %v1005_v2 = vpop.f32.mrf.mxu3 }
 0x1c6   : > { %v951_v12 = vpop.f32.mrf.mxu0  ;;  %v1006_v14 = vadd.f32 %v1005_v2, %v708_v3 }
 0x1c7   : > { %v952_v22 = vadd.f32 %v951_v12, %v713_v57 }
 0x1cd   : > { %v1008_v18 = vpop.f32.mrf.mxu3 }
 0x1ce   : > { %v953_v53 = vpop.f32.mrf.mxu0  ;;  %v965_v59 = vpop.f32.mrf.mxu1  ;;  %v1009_v23 = vadd.f32 %v1008_v18, %v713_v57 }
 0x1cf   : > { %v966_v63 = vadd.f32 %v965_v59, %v947_v60  ;;  %v954_v39 = vadd.f32 %v953_v53, %v718_v29 }
 0x1d1   : > { %v985_v5 = vadd.f32 %v984_v50, %v966_v63 }
 0x1d3   : > { %v1051_v10 = vmax.f32 %v985_v5, 0.0 }
 0x1d5   : > { %v1022_v4 = vpop.f32.mrf.mxu2  ;;  %v1010_v43 = vpop.f32.mrf.mxu3 }
 0x1d6   : > { %v1023_v62 = vadd.f32 %v1022_v4, %v1004_v61  ;;  %v967_v6 = vpop.f32.mrf.mxu1  ;;  %v1041_v7 = vpop.f32.mrf.mxu0  ;;  %v1011_v50 = vadd.f32 %v1010_v43, %v718_v29 }
 0x1d7   : > { %v968_v11 = vadd.f32 %v967_v6, %v949_v8 }
 0x1d8   : > { %v1042_v9 = vadd.f32 %v1041_v7, %v1023_v62 }
 0x1d9   : > { %v987_v17 = vadd.f32 %v986_v52, %v968_v11 }
 0x1da   : > { %v1052_v13 = vmax.f32 %v1042_v9, 0.0 }
 0x1db   : > { %v1053_v25 = vmax.f32 %v987_v17, 0.0 }
 0x1dc   : > { %v1059_v15 = vpack.c.bf16 %v1052_v13, %v1051_v10 }
 0x1dd   : > { %v1024_v16 = vpop.f32.mrf.mxu2 }
 0x1de   : > { %1259 = vst [vmem:[#allocation2 + $0x80] sm:$0xff] %v1059_v15  ;;  %v1025_v19 = vadd.f32 %v1024_v16, %v1006_v14  ;;  %v970_v20 = vpop.f32.mrf.mxu1  ;;  %v1043_v21 = vpop.f32.mrf.mxu0  ;;  %v1067_v30 = vunpack.c.l.b16 %v1059_v15  ;;  %v1068_v31 = vunpack.c.h.b16 %v1059_v15 }
 0x1df   : > { %v971_v26 = vadd.f32 %v970_v20, %v952_v22 }
 0x1e0   : > { %v1044_v24 = vadd.f32 %v1043_v21, %v1025_v19 }
 0x1e1   : > { %v990_v33 = vadd.f32 %v989_v55, %v971_v26 }
 0x1e2   : > { %v1054_v27 = vmax.f32 %v1044_v24, 0.0 }
 0x1e3   : > { %v1055_v45 = vmax.f32 %v990_v33, 0.0 }
 0x1e4   : > { %v1060_v28 = vpack.c.bf16 %v1054_v27, %v1053_v25 }
 0x1e5   : > { %v1027_v32 = vpop.f32.mrf.mxu2 }
 0x1e6   : > { %v1069_v34 = vunpack.c.l.b16 %v1060_v28  ;;  %v1070_v35 = vunpack.c.h.b16 %v1060_v28  ;;  %1260 = vst [vmem:[#allocation2 + $0x88] sm:$0xff] %v1060_v28  ;;  %v1028_v36 = vadd.f32 %v1027_v32, %v1009_v23  ;;  %v972_v37 = vpop.f32.mrf.mxu1  ;;  %v1046_v38 = vpop.f32.mrf.mxu0 }
 0x1e7   : > { %v973_v46 = vadd.f32 %v972_v37, %v954_v39 }
 0x1e8   : > { %v1047_v40 = vadd.f32 %v1046_v38, %v1028_v36  ;;  %v2585_v41 = vpack.c.b16 %v1070_v35, %v1068_v31  ;;  %v2587_v42 = vpack.c.b16 %v1069_v34, %v1067_v30 }
 0x1e9   : > { %v992_v54 = vadd.f32 %v991_v58, %v973_v46 }
 0x1ea   : > { %v1056_v49 = vmax.f32 %v1047_v40, 0.0  ;;  %1081 = vrot.lane.b32.xlu1 %v2585_v41, %s2342_s25  ;;  %1079 = vrot.lane.b32.xlu0 %v2587_v42, %s2342_s25 }
 0x1eb   : > { %v1057_v57 = vmax.f32 %v992_v54, 0.0 }
 0x1ec   : > { %v1061_v51 = vpack.c.bf16 %v1056_v49, %v1055_v45 }
 0x1ed   : > { %v1029_v52 = vpop.f32.mrf.mxu2 }
 0x1ee   : > { %1261 = vst [vmem:[#allocation2 + $0x90] sm:$0xff] %v1061_v51  ;;  %v1030_v55 = vadd.f32 %v1029_v52, %v1011_v50  ;;  %v1048_v12 = vpop.f32.mrf.mxu0  ;;  %v1071_v59 = vunpack.c.l.b16 %v1061_v51  ;;  %v1072_v60 = vunpack.c.h.b16 %v1061_v51 }
 0x1f0   : > { %v1049_v56 = vadd.f32 %v1048_v12, %v1030_v55 }
 0x1f2   : > { %v1058_v47 = vmax.f32 %v1049_v56, 0.0 }
 0x1f4   : > { %v1062_v53 = vpack.c.bf16 %v1058_v47, %v1057_v57 }
 0x1f6   : > { %v1073_v61 = vunpack.c.l.b16 %v1062_v53  ;;  %v1074_v63 = vunpack.c.h.b16 %v1062_v53  ;;  %1262 = vst [vmem:[#allocation2 + $0x98] sm:$0xff] %v1062_v53 }
 0x1f8   : > { %v2593_v2 = vpack.c.b16 %v1074_v63, %v1072_v60  ;;  %v1077_v3 = vpack.c.b16 %v1073_v61, %v1071_v59 }
 0x1fa   : > { %1085 = vrot.lane.b32.xlu2 %v2593_v2, %s2342_s25  ;;  %1083 = vrot.lane.b32.xlu1 %v1077_v3, %s2342_s25 }
 0x1fb   : > { %1107 = vrot.lane.b32.xlu0 %v2593_v2, %s2341_s24 }
 0x202   : > { %1105 = vrot.lane.b32.xlu2 %v1077_v3, %s2341_s24  ;;  %1101 = vrot.lane.b32.xlu1 %v2587_v42, %s2341_s24 }
 0x203   : > { %1321 = vrot.lane.b32.xlu0 %v2585_v41, %s2344_s27 }
 0x20a   : > { %1103 = vrot.lane.b32.xlu2 %v2585_v41, %s2341_s24  ;;  %1325 = vrot.lane.b32.xlu1 %v2593_v2, %s2344_s27 }
 0x20b   : > { %1323 = vrot.lane.b32.xlu0 %v1077_v3, %s2344_s27 }
 0x212   : > { %1319 = vrot.lane.b32.xlu2 %v2587_v42, %s2344_s27 }
 0x213   : > { %1167 = vrot.lane.b32.xlu0 %v1077_v3, %s2343_s26 }
 0x254   : > { %v1086_v58 = vpop.permute.xlu2 %1085 }
 0x25c   : > { %v1106_v4 = vpop.permute.xlu2 %1105  ;;  %v1082_v5 = vpop.permute.xlu1 %1081 }
 0x25d   : > { %v1080_v62 = vpop.permute.xlu0 %1079 }
 0x25e   : > { %v1087_v6 = vsel %vm295_vm6, %v1080_v62, %v1082_v5  ;;  %v1092_v7 = vsel %vm295_vm6, 0, %v1080_v62 }
 0x25f   : > { %v2617_v8 = vsel %vm2431_vm11, %v1092_v7, 0  ;;  %v2621_v9 = vsel %vm2439_vm12, %v1087_v6, 0 }
 0x260   : > { %v1239_v10 = vunpack.c.l.b16 %v2617_v8  ;;  %v1240_v11 = vunpack.c.l.b16 %v2621_v9  ;;  %v1241_v13 = vunpack.c.h.b16 %v2617_v8  ;;  %v1242_v14 = vunpack.c.h.b16 %v2621_v9  ;;  %1283 = vrot.lane.b32.xlu2 %v2617_v8, %s2344_s27  ;;  %1285 = vrot.lane.b32.xlu0 %v2621_v9, %s2344_s27 }
 0x262   : > { %v1247_v15 = vpack.c.b16 %v1240_v11, %v1239_v10  ;;  %v1248_v16 = vpack.c.b16 %v1242_v14, %v1241_v13 }
 0x264   : > { %1255 = vst [vmem:[#allocation2 + $0x60] sm:$0xff] %v1247_v15  ;;  %v1104_v17 = vpop.permute.xlu2 %1103 }
 0x265   : > { %1256 = vst [vmem:[#allocation2 + $0x68] sm:$0xff] %v1248_v16  ;;  %v1114_v18 = vsel %vm342_vm1, %v1104_v17, 0 }
 0x266   : > { %v2634_v19 = vsel %vm2456_vm3, %v1114_v18, 0 }
 0x267   : > { %v1264_v40 = vunpack.c.l.b16 %v2634_v19  ;;  %v1266_v49 = vunpack.c.h.b16 %v2634_v19 }
 0x268   : > { %1205 = vrot.lane.b32.xlu2 %v2634_v19, %s2343_s26 }
 0x26b   : > { %v2123_v6 = vld [vmem:[#allocation2 + $0x60] sm:$0xf]  ;;  %v2285_v7 = vld [vmem:[#allocation2 + $0x64] sm:$0xf] }
 0x26c   : > { %v1084_v20 = vpop.permute.xlu1 %1083  ;;  %v1320_v43 = vpop.permute.xlu2 %1319  ;;  %v2286_v11 = vld [vmem:[#allocation2 + $0x64] sm:$0xf0]  ;;  %v2125_v13 = vld [vmem:[#allocation2 + $0x68] sm:$0xf0] }
 0x26d   : > { %v1088_v21 = vsel %vm295_vm6, %v1084_v20, %v1086_v58  ;;  %v1095_v22 = vsel %vm295_vm6, 0, %v1084_v20  ;;  %v1108_v24 = vpop.permute.xlu0 %1107  ;;  %v2124_v18 = vor.u32 %v2286_v11, %v2123_v6  ;;  %v2696_v20 = vor.u32 %v2285_v7, %v2125_v13 }
 0x26e   : > { %v2642_v25 = vsel %vm2431_vm11, %v1095_v22, 0  ;;  %v2646_v26 = vsel %vm2439_vm12, %v1088_v21, 0  ;;  %v1110_v27 = vsel %vm342_vm1, %v1106_v4, %v1108_v24  ;;  %v1117_v23 = vsel %vm342_vm1, %v1108_v24, 0 }
 0x26f   : > { %v1243_v28 = vunpack.c.l.b16 %v2642_v25  ;;  %v1244_v29 = vunpack.c.l.b16 %v2646_v26  ;;  %v1245_v30 = vunpack.c.h.b16 %v2642_v25  ;;  %v1246_v31 = vunpack.c.h.b16 %v2646_v26 }
 0x270   : > { %v2656_v44 = vsel %vm2452_vm2, %v1110_v27, 0  ;;  %v2660_v48 = vsel %vm2456_vm3, %v1117_v23, 0  ;;  %1289 = vrot.lane.b32.xlu2 %v2646_v26, %s2344_s27 }
 0x271   : > { %v1249_v32 = vpack.c.b16 %v1244_v29, %v1243_v28  ;;  %v1250_v33 = vpack.c.b16 %v1246_v31, %v1245_v30  ;;  %v1267_v34 = vunpack.c.l.b16 %v2656_v44  ;;  %v1268_v35 = vunpack.c.l.b16 %v2660_v48  ;;  %1207 = vrot.lane.b32.xlu0 %v2656_v44, %s2343_s26  ;;  %v1437_v30 = vld [vmem:[%s2860_s4 + $0x10] sm:$0xff]  ;;  %v1438_v31 = vld [vmem:[%s2860_s4 + $0x18] sm:$0xff] }
 0x272   : > { %v1269_v36 = vunpack.c.h.b16 %v2656_v44  ;;  %v1270_v37 = vunpack.c.h.b16 %v2660_v48 }
 0x273   : > { %1257 = vst [vmem:[#allocation2 + $0x70] sm:$0xff] %v1249_v32  ;;  %v1273_v1 = vpack.c.b16 %v1268_v35, %v1267_v34 }
 0x274   : > { %1258 = vst [vmem:[#allocation2 + $0x78] sm:$0xff] %v1250_v33  ;;  %v1274_v38 = vpack.c.b16 %v1270_v37, %v1269_v36  ;;  %v1102_v39 = vpop.permute.xlu1 %1101 }
 0x275   : > { %1281 = vst [vmem:[#allocation2 + $0xb0] sm:$0xff] %v1273_v1  ;;  %v1109_v45 = vsel %vm342_vm1, %v1102_v39, %v1104_v17  ;;  %v1322_v46 = vpop.permute.xlu0 %1321 }
 0x276   : > { %1282 = vst [vmem:[#allocation2 + $0xb8] sm:$0xff] %v1274_v38  ;;  %v2675_v50 = vsel %vm2452_vm2, %v1109_v45, 0  ;;  %v1327_v51 = vsel %vm550_vm4, %v1320_v43, %v1322_v46  ;;  %v1330_v52 = vsel %vm550_vm4, %v1322_v46, 0 }
 0x277   : > { %v1263_v54 = vunpack.c.l.b16 %v2675_v50  ;;  %v1265_v55 = vunpack.c.h.b16 %v2675_v50  ;;  %v1335_v12 = vunpack.c.l.b16 %v1327_v51  ;;  %v1336_v56 = vunpack.c.l.b16 %v1330_v52  ;;  %1203 = vrot.lane.b32.xlu1 %v2675_v50, %s2343_s26 }
 0x278   : > { %v1337_v57 = vunpack.c.h.b16 %v1327_v51  ;;  %v1338_v47 = vunpack.c.h.b16 %v1330_v52  ;;  %1163 = vrot.lane.b32.xlu2 %v2587_v42, %s2343_s26 }
 0x279   : > { %v1271_v0 = vpack.c.b16 %v1264_v40, %v1263_v54  ;;  %v1272_v53 = vpack.c.b16 %v1266_v49, %v1265_v55  ;;  %v1343_v59 = vpack.c.b16 %v1336_v56, %v1335_v12  ;;  %1165 = vrot.lane.b32.xlu0 %v2585_v41, %s2343_s26 }
 0x27a   : > { %v1344_v60 = vpack.c.b16 %v1338_v47, %v1337_v57  ;;  %v2131_v61 = vld [vmem:[#allocation2 + $0x70] sm:$0xf]  ;;  %v2287_v63 = vld [vmem:[#allocation2 + $0x74] sm:$0xf] }
 0x27b   : > { %1279 = vst [vmem:[#allocation2 + $0xa0] sm:$0xff] %v1271_v0  ;;  %v2288_v3 = vld [vmem:[#allocation2 + $0x74] sm:$0xf0]  ;;  %v2133_v58 = vld [vmem:[#allocation2 + $0x78] sm:$0xf0] }
 0x27c   : > { %1280 = vst [vmem:[#allocation2 + $0xa8] sm:$0xff] %v1272_v53  ;;  %v1326_v4 = vpop.permute.xlu1 %1325  ;;  %v2132_v5 = vor.u32 %v2288_v3, %v2131_v61  ;;  %v2687_v62 = vor.u32 %v2287_v63, %v2133_v58 }
 0x27d   : > { %1351 = vst [vmem:[#allocation2 + $0xe0] sm:$0xff] %v1343_v59  ;;  %v1332_v42 = vsel %vm550_vm4, %v1326_v4, 0  ;;  %v1324_v10 = vpop.permute.xlu0 %1323 }
 0x27e   : > { %1352 = vst [vmem:[#allocation2 + $0xe8] sm:$0xff] %v1344_v60  ;;  %v1340_v41 = vunpack.c.l.b16 %v1332_v42  ;;  %v1342_v14 = vunpack.c.h.b16 %v1332_v42  ;;  %v1328_v15 = vsel %vm550_vm4, %v1324_v10, %v1326_v4  ;;  %1675 = vmatpush.bf16.msrb.mxu1 %v2132_v5  ;;  %1732 = vmatpush.bf16.msra.mxu0 %v2687_v62 }
 0x27f   : > { %v1339_v16 = vunpack.c.l.b16 %v1328_v15  ;;  %v1341_v17 = vunpack.c.h.b16 %v1328_v15  ;;  %1287 = vrot.lane.b32.xlu1 %v2642_v25, %s2344_s27 }
 0x280   : > { %1133 = vrot.lane.b32.xlu2 %v2646_v26, %s2343_s26 }
 0x281   : > { %v1345_v21 = vpack.c.b16 %v1340_v41, %v1339_v16  ;;  %v1346_v22 = vpack.c.b16 %v1342_v14, %v1341_v17  ;;  %1127 = vrot.lane.b32.xlu0 %v2617_v8, %s2343_s26  ;;  %v1435_v8 = vld [vmem:[%s2860_s4] sm:$0xff] }
 0x282   : > { %1676 = vmatpush.bf16.msrb.mxu1 %v2124_v18  ;;  %1733 = vmatpush.bf16.msra.mxu0 %v2696_v20 }
 0x283   : > { %1353 = vst [vmem:[#allocation2 + $0xf0] sm:$0xff] %v1345_v21 }
 0x284   : > { %1354 = vst [vmem:[#allocation2 + $0xf8] sm:$0xff] %v1346_v22  ;;  %v2187_v23 = vld [vmem:[#allocation2 + $0xe0] sm:$0xf] }
 0x285   : > { %v2302_v28 = vld [vmem:[#allocation2 + $0xe4] sm:$0xf0] }
 0x286   : > { %v2188_v29 = vor.u32 %v2302_v28, %v2187_v23 }
 0x287   : > { %1209 = vrot.lane.b32.xlu1 %v2660_v48, %s2343_s26 }
 0x288   : > { %1359 = vrot.lane.b32.xlu2 %v2656_v44, %s2344_s27  ;;  %v2729_v44 = vpop.permute.xlu0 %1167 }
 0x289   : > { %1361 = vrot.lane.b32.xlu0 %v2660_v48, %s2344_s27 }
 0x28a   : > { %v2195_v24 = vld [vmem:[#allocation2 + $0xf0] sm:$0xf] }
 0x28b   : > { %v2304_v26 = vld [vmem:[#allocation2 + $0xf4] sm:$0xf0] }
 0x28c   : > { %v2196_v27 = vor.u32 %v2304_v26, %v2195_v24 }
 0x28e   : > { %1694 = vmatpush.bf16.msrb.mxu3 %v2196_v27 }
 0x28f   : > { %1169 = vrot.lane.b32.xlu1 %v2593_v2, %s2343_s26  ;;  %v1436_v2 = vld [vmem:[%s2860_s4 + $0x8] sm:$0xff] }
 0x290   : > { %1357 = vrot.lane.b32.xlu2 %v2634_v19, %s2344_s27 }
 0x291   : > { %1441 = vperm.xlu0 %2331, %v1435_v8  }
 0x292   : > { %1695 = vmatpush.bf16.msrb.mxu3 %v2188_v29 }
 0x297   : > { %1131 = vrot.lane.b32.xlu1 %v2642_v25, %s2343_s26 }
 0x298   : > { %1451 = vperm.xlu2 %2330, %v1437_v30  }
 0x299   : > { %1456 = vperm.xlu0 %2331, %v1438_v31  }
 0x29f   : > { %1129 = vrot.lane.b32.xlu1 %v2621_v9, %s2343_s26 }
 0x2a7   : > { %1355 = vrot.lane.b32.xlu1 %v2675_v50, %s2344_s27 }
 0x2af   : > { %1446 = vperm.xlu1 %2332, %v1436_v2  }
 0x2ba   : > { %v1284_v19 = vpop.permute.xlu2 %1283 }
 0x2c2   : > { %v1206_v32 = vpop.permute.xlu2 %1205 }
 0x2ca   : > { %v1290_v38 = vpop.permute.xlu2 %1289 }
 0x2cb   : > { %v1296_v60 = vsel %vm550_vm4, %v1290_v38, 0 }
 0x2cc   : > { %v1304_v5 = vunpack.c.l.b16 %v1296_v60  ;;  %v1306_v6 = vunpack.c.h.b16 %v1296_v60 }
 0x2d2   : > { %v1286_v48 = vpop.permute.xlu0 %1285  ;;  %v1164_v40 = vpop.permute.xlu2 %1163 }
 0x2d3   : > { %v1291_v25 = vsel %vm550_vm4, %v1284_v19, %v1286_v48  ;;  %v1294_v33 = vsel %vm550_vm4, %v1286_v48, 0  ;;  %v1174_v45 = vsel %vm392_vm5, 0, %v1164_v40 }
 0x2d4   : > { %v1299_v34 = vunpack.c.l.b16 %v1291_v25  ;;  %v1300_v35 = vunpack.c.l.b16 %v1294_v33  ;;  %v1301_v9 = vunpack.c.h.b16 %v1291_v25  ;;  %v1302_v36 = vunpack.c.h.b16 %v1294_v33 }
 0x2d5   : > { %v1179_v47 = vunpack.c.l.b16 %v1174_v45  ;;  %v1181_v0 = vunpack.c.h.b16 %v1174_v45 }
 0x2d6   : > { %v1307_v37 = vpack.c.b16 %v1300_v35, %v1299_v34  ;;  %v1308_v1 = vpack.c.b16 %v1302_v36, %v1301_v9 }
 0x2d8   : > { %1315 = vst [vmem:[#allocation2 + $0xc0] sm:$0xff] %v1307_v37 }
 0x2d9   : > { %1316 = vst [vmem:[#allocation2 + $0xc8] sm:$0xff] %v1308_v1 }
 0x2da   : > { %v2738_v3 = vpop.permute.xlu2 %1133 }
 0x2df   : > { %v2171_v35 = vld [vmem:[#allocation2 + $0xc0] sm:$0xf] }
 0x2e0   : > { %v2298_v9 = vld [vmem:[#allocation2 + $0xc4] sm:$0xf0] }
 0x2e2   : > { %v1360_v16 = vpop.permute.xlu2 %1359 }
 0x2e3   : > { %v1208_v39 = vpop.permute.xlu0 %1207 }
 0x2e4   : > { %v1216_v41 = vsel %vm392_vm5, 0, %v1208_v39 }
 0x2e5   : > { %v1223_v17 = vunpack.c.l.b16 %v1216_v41  ;;  %v1225_v18 = vunpack.c.h.b16 %v1216_v41 }
 0x2e9   : > { %v1204_v43 = vpop.permute.xlu1 %1203 }
 0x2ea   : > { %v1211_v46 = vsel %vm392_vm5, %v1204_v43, %v1206_v32  ;;  %v1214_v49 = vsel %vm392_vm5, 0, %v1204_v43  ;;  %v1176_v32 = vsel %vm392_vm5, 0, %v2729_v44 }
 0x2eb   : > { %v1219_v50 = vunpack.c.l.b16 %v1214_v49  ;;  %v1220_v51 = vunpack.c.l.b16 %v1211_v46  ;;  %v1221_v52 = vunpack.c.h.b16 %v1214_v49  ;;  %v1222_v54 = vunpack.c.h.b16 %v1211_v46  ;;  %v1166_v55 = vpop.permute.xlu0 %1165  ;;  %v2163_v46 = vld [vmem:[#allocation2 + $0xb0] sm:$0xf]  ;;  %v2296_v49 = vld [vmem:[#allocation2 + $0xb4] sm:$0xf0] }
 0x2ec   : > { %v1171_v12 = vsel %vm392_vm5, %v1164_v40, %v1166_v55  ;;  %v1183_v37 = vunpack.c.l.b16 %v1176_v32  ;;  %v1185_v1 = vunpack.c.h.b16 %v1176_v32  ;;  %v2172_v40 = vor.u32 %v2298_v9, %v2171_v35  ;;  %v2155_v55 = vld [vmem:[#allocation2 + $0xa0] sm:$0xf] }
 0x2ed   : > { %v1227_v56 = vpack.c.b16 %v1220_v51, %v1219_v50  ;;  %v1228_v57 = vpack.c.b16 %v1222_v54, %v1221_v52  ;;  %v1180_v53 = vunpack.c.l.b16 %v1171_v12  ;;  %v1182_v59 = vunpack.c.h.b16 %v1171_v12 }
 0x2ef   : > { %1235 = vst [vmem:[#allocation2 + $0x40] sm:$0xff] %v1227_v56  ;;  %v1187_v61 = vpack.c.b16 %v1180_v53, %v1179_v47  ;;  %v1188_v63 = vpack.c.b16 %v1182_v59, %v1181_v0  ;;  %v2294_v47 = vld [vmem:[#allocation2 + $0xa4] sm:$0xf0] }
 0x2f0   : > { %1236 = vst [vmem:[#allocation2 + $0x48] sm:$0xff] %v1228_v57  ;;  %v2156_v41 = vor.u32 %v2294_v47, %v2155_v55 }
 0x2f1   : > { %v1288_v58 = vpop.permute.xlu1 %1287  ;;  %1195 = vst [vmem:[#allocation2 + $0x20] sm:$0xff] %v1187_v61 }
 0x2f2   : > { %v1292_v4 = vsel %vm550_vm4, %v1288_v58, %v1290_v38  ;;  %1196 = vst [vmem:[#allocation2 + $0x28] sm:$0xff] %v1188_v63 }
 0x2f3   : > { %v1303_v7 = vunpack.c.l.b16 %v1292_v4  ;;  %v1305_v42 = vunpack.c.h.b16 %v1292_v4  ;;  %v2741_v10 = vpop.permute.xlu0 %1127 }
 0x2f5   : > { %v1309_v11 = vpack.c.b16 %v1304_v5, %v1303_v7  ;;  %v1310_v13 = vpack.c.b16 %v1306_v6, %v1305_v42 }
 0x2f6   : > { %v2107_v59 = vld [vmem:[#allocation2 + $0x40] sm:$0xf]  ;;  %v2281_v4 = vld [vmem:[#allocation2 + $0x44] sm:$0xf] }
 0x2f7   : > { %1317 = vst [vmem:[#allocation2 + $0xd0] sm:$0xff] %v1309_v11  ;;  %v2282_v60 = vld [vmem:[#allocation2 + $0x44] sm:$0xf0]  ;;  %v2109_v5 = vld [vmem:[#allocation2 + $0x48] sm:$0xf0] }
 0x2f8   : > { %1318 = vst [vmem:[#allocation2 + $0xd8] sm:$0xff] %v1310_v13  ;;  %v2108_v13 = vor.u32 %v2282_v60, %v2107_v59 }
 0x2f9   : > { %v1210_v14 = vpop.permute.xlu1 %1209 }
 0x2fa   : > { %v1212_v15 = vsel %vm392_vm5, %v1208_v39, %v1210_v14 }
 0x2fb   : > { %v1224_v21 = vunpack.c.l.b16 %v1212_v15  ;;  %v1226_v22 = vunpack.c.h.b16 %v1212_v15  ;;  %v1362_v24 = vpop.permute.xlu0 %1361 }
 0x2fc   : > { %v1364_v26 = vsel %vm550_vm4, %v1360_v16, %v1362_v24  ;;  %v1368_v27 = vsel %vm550_vm4, %v1362_v24, 0  ;;  %v2757_v16 = vor.u32 %v2281_v4, %v2109_v5  ;;  %v2197_v4 = vld [vmem:[#allocation2 + $0xf8] sm:$0xf0]  ;;  %v2051_v5 = vld [vmem:[%s2859_s3] sm:$0xf] }
 0x2fd   : > { %v1229_v23 = vpack.c.b16 %v1224_v21, %v1223_v17  ;;  %v1230_v28 = vpack.c.b16 %v1226_v22, %v1225_v18  ;;  %v1375_v8 = vunpack.c.l.b16 %v1364_v26  ;;  %v1376_v29 = vunpack.c.l.b16 %v1368_v27  ;;  %v2147_v18 = vld [vmem:[#allocation2 + $0x90] sm:$0xf] }
 0x2fe   : > { %v1377_v30 = vunpack.c.h.b16 %v1364_v26  ;;  %v1378_v31 = vunpack.c.h.b16 %v1368_v27  ;;  %v2179_v2 = vld [vmem:[#allocation2 + $0xd0] sm:$0xf]  ;;  %v2290_v26 = vld [vmem:[#allocation2 + $0x84] sm:$0xf0]  ;;  %v1138_v27 = vsel %vm392_vm5, 0, %v2741_v10 }
 0x2ff   : > { %1237 = vst [vmem:[#allocation2 + $0x50] sm:$0xff] %v1229_v23  ;;  %v1381_v19 = vpack.c.b16 %v1376_v29, %v1375_v8  ;;  %v2300_v48 = vld [vmem:[#allocation2 + $0xd4] sm:$0xf0]  ;;  %v2091_v29 = vld [vmem:[#allocation2 + $0x20] sm:$0xf]  ;;  %v1143_v35 = vunpack.c.l.b16 %v1138_v27  ;;  %v1145_v9 = vunpack.c.h.b16 %v1138_v27 }
 0x300   : > { %1238 = vst [vmem:[#allocation2 + $0x58] sm:$0xff] %v1230_v28  ;;  %v1382_v25 = vpack.c.b16 %v1378_v31, %v1377_v30  ;;  %v2180_v33 = vor.u32 %v2300_v48, %v2179_v2  ;;  %v2277_v30 = vld [vmem:[#allocation2 + $0x24] sm:$0xf]  ;;  %v2278_v2 = vld [vmem:[#allocation2 + $0x24] sm:$0xf0] }
 0x301   : > { %1389 = vst [vmem:[#allocation2 + $0x110] sm:$0xff] %v1381_v19  ;;  %v1170_v34 = vpop.permute.xlu1 %1169  ;;  %v2093_v19 = vld [vmem:[#allocation2 + $0x28] sm:$0xf0]  ;;  %v2267_v48 = vld [vmem:[%s2859_s3 + $0x4] sm:$0xf] }
 0x302   : > { %1390 = vst [vmem:[#allocation2 + $0x118] sm:$0xff] %v1382_v25  ;;  %v1172_v36 = vsel %vm392_vm5, %v2729_v44, %v1170_v34  ;;  %1696 = vmatpush.bf16.msrb.mxu3 %v2180_v33  ;;  %v2164_v44 = vor.u32 %v2296_v49, %v2163_v46  ;;  %v2053_v34 = vld [vmem:[%s2859_s3 + $0xc] sm:$0xf0]  ;;  %v2181_v27 = vld [vmem:[#allocation2 + $0xd8] sm:$0xf0] }
 0x303   : > { %v1184_v38 = vunpack.c.l.b16 %v1172_v36  ;;  %v1186_v39 = vunpack.c.h.b16 %v1172_v36  ;;  %v2775_v49 = vor.u32 %v2267_v48, %v2053_v34  ;;  %v2297_v34 = vld [vmem:[#allocation2 + $0xc4] sm:$0xf] }
 0x305   : > { %v1189_v43 = vpack.c.b16 %v1184_v38, %v1183_v37  ;;  %v1190_v45 = vpack.c.b16 %v1186_v39, %v1185_v1  ;;  %v2139_v1 = vld [vmem:[#allocation2 + $0x80] sm:$0xf]  ;;  %v2092_v38 = vor.u32 %v2278_v2, %v2091_v29 }
 0x306   : > { %1697 = vmatpush.bf16.msrb.mxu3 %v2172_v40  ;;  %v2115_v50 = vld [vmem:[#allocation2 + $0x50] sm:$0xf]  ;;  %v2283_v51 = vld [vmem:[#allocation2 + $0x54] sm:$0xf]  ;;  %v2140_v39 = vor.u32 %v2290_v26, %v2139_v1  ;;  %v2773_v40 = vor.u32 %v2277_v30, %v2093_v19  ;;  %v2063_v1 = vld [vmem:[%s2859_s3 + $0x18] sm:$0xf] }
 0x307   : > { %1197 = vst [vmem:[#allocation2 + $0x30] sm:$0xff] %v1189_v43  ;;  %v2284_v52 = vld [vmem:[#allocation2 + $0x54] sm:$0xf0]  ;;  %v2117_v54 = vld [vmem:[#allocation2 + $0x58] sm:$0xf0] }
 0x308   : > { %1198 = vst [vmem:[#allocation2 + $0x38] sm:$0xff] %v1190_v45  ;;  %v2116_v12 = vor.u32 %v2284_v52, %v2115_v50  ;;  %v2211_v56 = vld [vmem:[#allocation2 + $0x110] sm:$0xf]  ;;  %v2751_v57 = vor.u32 %v2283_v51, %v2117_v54  ;;  %v2307_v25 = vld [vmem:[#allocation2 + $0x114] sm:$0xf] }
 0x309   : > { %v1132_v0 = vpop.permute.xlu1 %1131  ;;  %v2308_v53 = vld [vmem:[#allocation2 + $0x114] sm:$0xf0]  ;;  %v2213_v33 = vld [vmem:[#allocation2 + $0x118] sm:$0xf0]  ;;  %v2299_v26 = vld [vmem:[#allocation2 + $0xd4] sm:$0xf] }
 0x30a   : > { %v1136_v61 = vsel %vm392_vm5, %v1132_v0, %v2738_v3  ;;  %v1140_v63 = vsel %vm392_vm5, 0, %v1132_v0  ;;  %1677 = vmatpush.bf16.msrb.mxu1 %v2116_v12  ;;  %1698 = vmatpush.bf16.msrb.mxu3 %v2164_v44  ;;  %v2212_v58 = vor.u32 %v2308_v53, %v2211_v56  ;;  %v2292_v3 = vld [vmem:[#allocation2 + $0x94] sm:$0xf0]  ;;  %v2216_v46 = vor.u32 %v2307_v25, %v2213_v33 }
 0x30b   : > { %v1147_v6 = vunpack.c.l.b16 %v1140_v63  ;;  %v1148_v7 = vunpack.c.l.b16 %v1136_v61  ;;  %v1149_v42 = vunpack.c.h.b16 %v1140_v63  ;;  %v1150_v11 = vunpack.c.h.b16 %v1136_v61  ;;  %1734 = vmatpush.bf16.msra.mxu0 %v2751_v57 }
 0x30c   : > { %1719 = vmatpush.bf16.msra.mxu2 %v2212_v58  ;;  %v2148_v28 = vor.u32 %v2292_v3, %v2147_v18  ;;  %v2303_v58 = vld [vmem:[#allocation2 + $0xf4] sm:$0xf]  ;;  %v2189_v18 = vld [vmem:[#allocation2 + $0xe8] sm:$0xf0]  ;;  %v2184_v25 = vor.u32 %v2299_v26, %v2181_v27 }
 0x30d   : > { %v1153_v14 = vpack.c.b16 %v1148_v7, %v1147_v6  ;;  %v1154_v15 = vpack.c.b16 %v1150_v11, %v1149_v42  ;;  %v2268_v42 = vld [vmem:[%s2859_s3 + $0x8] sm:$0xf0] }
 0x30e   : > { %1678 = vmatpush.bf16.msrb.mxu1 %v2108_v13  ;;  %1699 = vmatpush.bf16.msrb.mxu3 %v2156_v41  ;;  %v2099_v17 = vld [vmem:[#allocation2 + $0x30] sm:$0xf]  ;;  %v2279_v21 = vld [vmem:[#allocation2 + $0x34] sm:$0xf]  ;;  %v2052_v3 = vor.u32 %v2268_v42, %v2051_v5 }
 0x30f   : > { %1161 = vst [vmem:[#allocation2 + $0x10] sm:$0xff] %v1153_v14  ;;  %1735 = vmatpush.bf16.msra.mxu0 %v2757_v16  ;;  %v2280_v22 = vld [vmem:[#allocation2 + $0x34] sm:$0xf0]  ;;  %v2101_v24 = vld [vmem:[#allocation2 + $0x38] sm:$0xf0]  ;;  %v1791_v42 = vld [vmem:[%s2392_s23 + $0x10] sm:$0xff] }
 0x310   : > { %1162 = vst [vmem:[#allocation2 + $0x18] sm:$0xff] %v1154_v15  ;;  %v2100_v23 = vor.u32 %v2280_v22, %v2099_v17  ;;  %v2762_v8 = vor.u32 %v2279_v21, %v2101_v24  ;;  %v2200_v15 = vor.u32 %v2303_v58, %v2197_v4  ;;  %v2301_v17 = vld [vmem:[#allocation2 + $0xe4] sm:$0xf]  ;;  %v2270_v21 = vld [vmem:[%s2859_s3 + $0x1c] sm:$0xf] }
 0x311   : > { %v1130_v31 = vpop.permute.xlu1 %1129  ;;  %v2065_v22 = vld [vmem:[%s2859_s3 + $0x24] sm:$0xf0]  ;;  %v2192_v24 = vor.u32 %v2301_v17, %v2189_v18 }
 0x312   : > { %v1135_v32 = vsel %vm392_vm5, %v2741_v10, %v1130_v31  ;;  %1679 = vmatpush.bf16.msrb.mxu1 %v2100_v23  ;;  %1700 = vmatpush.bf16.msrb.mxu3 %v2148_v28  ;;  %v1358_v10 = vpop.permute.xlu2 %1357  ;;  %v2059_v23 = vld [vmem:[%s2859_s3 + $0x8] sm:$0xf]  ;;  %v2068_v28 = vor.u32 %v2270_v21, %v2065_v22  ;;  %v2269_v31 = vld [vmem:[%s2859_s3 + $0x10] sm:$0xf0]  ;;  %v1793_v22 = vld [vmem:[%s2392_s23 + $0x20] sm:$0xff] }
 0x313   : > { %v1144_v36 = vunpack.c.l.b16 %v1135_v32  ;;  %v1146_v37 = vunpack.c.h.b16 %v1135_v32  ;;  %1736 = vmatpush.bf16.msra.mxu0 %v2762_v8  ;;  %v1366_v55 = vsel %vm550_vm4, %v1358_v10, 0  ;;  %v2060_v33 = vor.u32 %v2269_v31, %v2059_v23  ;;  %v1790_v31 = vld [vmem:[%s2392_s23 + $0x8] sm:$0xff] }
 0x314   : > { %v1372_v0 = vunpack.c.l.b16 %v1366_v55  ;;  %v1374_v53 = vunpack.c.h.b16 %v1366_v55  ;;  %v2289_v55 = vld [vmem:[#allocation2 + $0x84] sm:$0xf] }
 0x315   : > { %v1151_v43 = vpack.c.b16 %v1144_v36, %v1143_v35  ;;  %v1152_v45 = vpack.c.b16 %v1146_v37, %v1145_v9  ;;  %v2173_v35 = vld [vmem:[#allocation2 + $0xc8] sm:$0xf0]  ;;  %v2295_v36 = vld [vmem:[#allocation2 + $0xb4] sm:$0xf]  ;;  %v2165_v37 = vld [vmem:[#allocation2 + $0xb8] sm:$0xf0] }
 0x316   : > { %1680 = vmatpush.bf16.msrb.mxu1 %v2092_v38  ;;  %1701 = vmatpush.bf16.msrb.mxu3 %v2140_v39  ;;  %v2083_v50 = vld [vmem:[#allocation2 + $0x10] sm:$0xf]  ;;  %v2275_v51 = vld [vmem:[#allocation2 + $0x14] sm:$0xf]  ;;  %v2176_v9 = vor.u32 %v2297_v34, %v2173_v35  ;;  %v2271_v38 = vld [vmem:[%s2859_s3 + $0x20] sm:$0xf0]  ;;  %v2168_v39 = vor.u32 %v2295_v36, %v2165_v37 }
 0x317   : > { %1159 = vst [vmem:[#allocation2] sm:$0xff] %v1151_v43  ;;  %1737 = vmatpush.bf16.msra.mxu0 %v2773_v40  ;;  %v2276_v52 = vld [vmem:[#allocation2 + $0x14] sm:$0xf0]  ;;  %v2085_v54 = vld [vmem:[#allocation2 + $0x18] sm:$0xf0] }
 0x318   : > { %1160 = vst [vmem:[#allocation2 + $0x8] sm:$0xff] %v1152_v45  ;;  %v2084_v12 = vor.u32 %v2276_v52, %v2083_v50  ;;  %v2779_v44 = vor.u32 %v2275_v51, %v2085_v54  ;;  %v2157_v43 = vld [vmem:[#allocation2 + $0xa8] sm:$0xf0]  ;;  %v2071_v50 = vld [vmem:[%s2859_s3 + $0x20] sm:$0xf] }
 0x319   : > { %v1356_v56 = vpop.permute.xlu1 %1355  ;;  %1702 = vmatmul.bf16.vlgmr.msrb.gmra.mxu3 %v2775_v49  ;;  %v2272_v51 = vld [vmem:[%s2859_s3 + $0x28] sm:$0xf0] }
 0x31a   : > { %1776 = vmatpush.bf16.msra.mxu3 %v2216_v46  ;;  %v1363_v47 = vsel %vm550_vm4, %v1356_v56, %v1358_v10  ;;  %1681 = vmatpush.bf16.msrb.mxu1 %v2084_v12  ;;  %v2064_v10 = vor.u32 %v2271_v38, %v2063_v1  ;;  %v2149_v46 = vld [vmem:[#allocation2 + $0x98] sm:$0xf0]  ;;  %v2072_v54 = vor.u32 %v2272_v51, %v2071_v50  ;;  %v1794_v51 = vld [vmem:[%s2392_s23 + $0x28] sm:$0xff] }
 0x31b   : > { %v1371_v59 = vunpack.c.l.b16 %v1363_v47  ;;  %v1373_v60 = vunpack.c.h.b16 %v1363_v47  ;;  %1738 = vmatpush.bf16.msra.mxu0 %v2779_v44  ;;  %v1442_v47 = vpop.permute.xlu0 %1441  ;;  %v1792_v38 = vld [vmem:[%s2392_s23 + $0x18] sm:$0xff] }
 0x31d   : > { %v1379_v61 = vpack.c.b16 %v1372_v0, %v1371_v59  ;;  %v1380_v63 = vpack.c.b16 %v1374_v53, %v1373_v60 }
 0x31e   : > { %v2075_v6 = vld [vmem:[#allocation2] sm:$0xf]  ;;  %v2273_v7 = vld [vmem:[#allocation2 + $0x4] sm:$0xf] }
 0x31f   : > { %1387 = vst [vmem:[#allocation2 + $0x100] sm:$0xff] %v1379_v61  ;;  %v2274_v11 = vld [vmem:[#allocation2 + $0x4] sm:$0xf0]  ;;  %v2077_v13 = vld [vmem:[#allocation2 + $0x8] sm:$0xf0] }
 0x320   : > { %1388 = vst [vmem:[#allocation2 + $0x108] sm:$0xff] %v1380_v63  ;;  %v2076_v41 = vor.u32 %v2274_v11, %v2075_v6  ;;  %v2790_v14 = vor.u32 %v2273_v7, %v2077_v13  ;;  %v1452_v13 = vpop.permute.xlu2 %1451 }
 0x322   : > { %1682 = vmatpush.bf16.msrb.mxu1 %v2076_v41  ;;  %1739 = vmatpush.bf16.msra.mxu0 %v2790_v14 }
 0x323   : > { %v1457_v27 = vpop.permute.xlu0 %1456 }
 0x325   : > { %1683 = vmatmul.bf16.vlgmr.msrb.gmra.mxu1 %v2052_v3  ;;  %1740 = vmatmul.bf16.vlgmr.msra.gmra.mxu0 %v2052_v3 }
 0x326   : > { %1751 = vmatpush.bf16.msra.mxu1 %v2200_v15  ;;  %v2203_v29 = vld [vmem:[#allocation2 + $0x100] sm:$0xf]  ;;  %v2305_v30 = vld [vmem:[#allocation2 + $0x104] sm:$0xf] }
 0x327   : > { %v2306_v2 = vld [vmem:[#allocation2 + $0x104] sm:$0xf0]  ;;  %v2205_v19 = vld [vmem:[#allocation2 + $0x108] sm:$0xf0] }
 0x328   : > { %v2204_v48 = vor.u32 %v2306_v2, %v2203_v29  ;;  %v2208_v32 = vor.u32 %v2305_v30, %v2205_v19 }
 0x329   : > { %1707 = vmatmul.bf16.gmra.mxu3 %v2068_v28 }
 0x32a   : > { %1752 = vmatpush.bf16.msra.mxu1 %v2192_v24  ;;  %1720 = vmatpush.bf16.msra.mxu2 %v2204_v48 }
 0x32b   : > { %1777 = vmatpush.bf16.msra.mxu3 %v2208_v32 }
 0x32d   : > { %2217 = vmatmul.msk.bf16.vlgmr.msra.gmra.mxu2 %vm930_vm7, %v2060_v33 }
 0x32e   : > { %2309 = vmatpush.bf16.msrb.mxu2 %v2687_v62  ;;  %1753 = vmatpush.bf16.msra.mxu1 %v2184_v25  ;;  %v2293_v62 = vld [vmem:[#allocation2 + $0xa4] sm:$0xf] }
 0x32f   : > { %v2160_v45 = vor.u32 %v2293_v62, %v2157_v43 }
 0x332   : > { %2310 = vmatpush.bf16.msrb.mxu2 %v2696_v20  ;;  %1754 = vmatpush.bf16.msra.mxu1 %v2176_v9  ;;  %v2291_v20 = vld [vmem:[#allocation2 + $0x94] sm:$0xf] }
 0x333   : > { %v2152_v52 = vor.u32 %v2291_v20, %v2149_v46 }
 0x335   : > { %1688 = vmatmul.bf16.gmra.mxu1 %v2064_v10 }
 0x336   : > { %2311 = vmatpush.bf16.msrb.mxu2 %v2751_v57  ;;  %1755 = vmatpush.bf16.msra.mxu1 %v2168_v39  ;;  %v2141_v57 = vld [vmem:[#allocation2 + $0x88] sm:$0xf0] }
 0x337   : > { %v2144_v12 = vor.u32 %v2289_v55, %v2141_v57 }
 0x339   : > { %2219 = vmatmul.msk.bf16.vlgmr.msra.gmra.mxu3 %vm930_vm7, %v2060_v33  ;;  %v1795_v33 = vld [vmem:[%s2392_s23 + $0x30] sm:$0xff] }
 0x33a   : > { %2312 = vmatpush.bf16.msrb.mxu2 %v2757_v16  ;;  %1756 = vmatpush.bf16.msra.mxu1 %v2160_v45 }
 0x33d   : > { %2218 = vmatmul.msk.bf16.gmra.mxu2 %vm930_vm7, %v2072_v54 }
 0x33e   : > { %2313 = vmatpush.bf16.msrb.mxu2 %v2762_v8  ;;  %1757 = vmatpush.bf16.msra.mxu1 %v2152_v52 }
 0x342   : > { %2314 = vmatpush.bf16.msrb.mxu2 %v2773_v40  ;;  %1758 = vmatpush.bf16.msra.mxu1 %v2144_v12 }
 0x345   : > { %1759 = vmatmul.bf16.vlgmr.msra.gmra.mxu1 %v2775_v49  ;;  %v1447_v49 = vpop.permute.xlu1 %1446 }
 0x346   : > { %2315 = vmatpush.bf16.msrb.mxu2 %v2779_v44  ;;  %v1789_v44 = vld [vmem:[%s2392_s23] sm:$0xff] }
 0x349   : > { %2220 = vmatmul.msk.bf16.gmra.mxu3 %vm930_vm7, %v2072_v54 }
 0x34a   : > { %2316 = vmatpush.bf16.msrb.mxu2 %v2790_v14 }
 0x34d   : > { %1745 = vmatmul.bf16.vlgmr.msrb.gmra.mxu2 %v2064_v10 }
 0x355   : > { %1764 = vmatmul.bf16.gmra.mxu1 %v2068_v28 }
 0x39c   : > { %v1703_v16 = vpop.f32.mrf.mxu3 }
 0x3a2   : > { %v1684_v8 = vpop.f32.mrf.mxu1  ;;  %v1741_v3 = vpop.f32.mrf.mxu0 }
 0x3a3   : > { %v1685_v40 = vadd.f32 %v1684_v8, %v1442_v47  ;;  %v1742_v24 = vadd.f32 %v1741_v3, %v1442_v47  ;;  %v1796_v8 = vld [vmem:[%s2392_s23 + $0x38] sm:$0xff] }
 0x3a4   : > { %v1705_v56 = vpop.f32.mrf.mxu3 }
 0x3a5   : > { %v1704_v59 = vadd.f32 %v1703_v16, %v1685_v40 }
 0x3aa   : > { %v1686_v0 = vpop.f32.mrf.mxu1  ;;  %v1743_v19 = vpop.f32.mrf.mxu0 }
 0x3ab   : > { %v1687_v58 = vadd.f32 %v1686_v0, %v1447_v49  ;;  %v1744_v35 = vadd.f32 %v1743_v19, %v1447_v49 }
 0x3ac   : > { %v1708_v53 = vpop.f32.mrf.mxu3 }
 0x3ad   : > { %v1706_v6 = vadd.f32 %v1705_v56, %v1687_v58 }
 0x3b0   : > { %v1722_v60 = vpop.f32.mrf.mxu2 }
 0x3b1   : > { %v1723_v61 = vadd.f32 %v1722_v60, %v1704_v59 }
 0x3b2   : > { %v1689_v63 = vpop.f32.mrf.mxu1 }
 0x3b3   : > { %v1797_v4 = vadd.f32 %v1789_v44, %v1723_v61  ;;  %v1690_v14 = vadd.f32 %v1689_v63, %v1452_v13 }
 0x3b4   : > { %v1710_v5 = vpop.f32.mrf.mxu3 }
 0x3b5   : > { %1805 = vst [vmem:[%s2836_s10] sm:$0xff] %v1797_v4  ;;  %v1709_v18 = vadd.f32 %v1708_v53, %v1690_v14 }
 0x3b8   : > { %v1724_v7 = vpop.f32.mrf.mxu2 }
 0x3b9   : > { %v1725_v11 = vadd.f32 %v1724_v7, %v1706_v6 }
 0x3ba   : > { %v1691_v41 = vpop.f32.mrf.mxu1 }
 0x3bb   : > { %v1799_v15 = vadd.f32 %v1791_v42, %v1725_v11  ;;  %v1692_v28 = vadd.f32 %v1691_v41, %v1457_v27 }
 0x3bc   : > { %v1779_v17 = vpop.f32.mrf.mxu3 }
 0x3bd   : > { %1807 = vst [vmem:[%s2836_s10 + $0x10] sm:$0xff] %v1799_v15  ;;  %v1711_v48 = vadd.f32 %v1710_v5, %v1692_v28 }
 0x3c0   : > { %v1727_v21 = vpop.f32.mrf.mxu2 }
 0x3c1   : > { %v1728_v26 = vadd.f32 %v1727_v21, %v1709_v18 }
 0x3c2   : > { %v1760_v23 = vpop.f32.mrf.mxu1 }
 0x3c3   : > { %v1801_v29 = vadd.f32 %v1793_v22, %v1728_v26  ;;  %v1761_v30 = vadd.f32 %v1760_v23, %v1742_v24 }
 0x3c4   : > { %v1781_v34 = vpop.f32.mrf.mxu3 }
 0x3c5   : > { %1809 = vst [vmem:[%s2836_s10 + $0x20] sm:$0xff] %v1801_v29  ;;  %v1780_v2 = vadd.f32 %v1779_v17, %v1761_v30 }
 0x3c7   : > { %v1798_v32 = vadd.f32 %v1790_v31, %v1780_v2 }
 0x3c8   : > { %v1729_v25 = vpop.f32.mrf.mxu2 }
 0x3c9   : > { %1806 = vst [vmem:[%s2836_s10 + $0x8] sm:$0xff] %v1798_v32  ;;  %v1730_v9 = vadd.f32 %v1729_v25, %v1711_v48 }
 0x3ca   : > { %v1762_v36 = vpop.f32.mrf.mxu1 }
 0x3cb   : > { %v1803_v37 = vadd.f32 %v1795_v33, %v1730_v9  ;;  %v1763_v1 = vadd.f32 %v1762_v36, %v1744_v35 }
 0x3cc   : > { %v1784_v46 = vpop.f32.mrf.mxu3 }
 0x3cd   : > { %1811 = vst [vmem:[%s2836_s10 + $0x30] sm:$0xff] %v1803_v37  ;;  %v1782_v39 = vadd.f32 %v1781_v34, %v1763_v1 }
 0x3cf   : > { %v1800_v10 = vadd.f32 %v1792_v38, %v1782_v39 }
 0x3d0   : > { %v1746_v62 = vpop.f32.mrf.mxu2 }
 0x3d1   : > { %1808 = vst [vmem:[%s2836_s10 + $0x18] sm:$0xff] %v1800_v10  ;;  %v1747_v43 = vadd.f32 %v1746_v62, %v1452_v13 }
 0x3d2   : > { %v1765_v45 = vpop.f32.mrf.mxu1 }
 0x3d3   : > { %v1766_v50 = vadd.f32 %v1765_v45, %v1747_v43 }
 0x3d4   : > { %v1786_v16 = vpop.f32.mrf.mxu3 }
 0x3d5   : > { %v1785_v20 = vadd.f32 %v1784_v46, %v1766_v50 }
 0x3d7   : > { %v1802_v52 = vadd.f32 %v1794_v51, %v1785_v20 }
 0x3d8   : > { %v1748_v54 = vpop.f32.mrf.mxu2 }
 0x3d9   : > { %1810 = vst [vmem:[%s2836_s10 + $0x28] sm:$0xff] %v1802_v52  ;;  %v1749_v57 = vadd.f32 %v1748_v54, %v1457_v27 }
 0x3da   : > { %v1767_v55 = vpop.f32.mrf.mxu1 }
 0x3db   : > { %v1768_v12 = vadd.f32 %v1767_v55, %v1749_v57 }
 0x3dd   : > { %v1787_v56 = vadd.f32 %v1786_v16, %v1768_v12 }
 0x3df   : > { %v1804_v47 = vadd.f32 %v1796_v8, %v1787_v56 }
 0x3e1   : > { %1812 = vst [vmem:[%s2836_s10 + $0x38] sm:$0xff] %v1804_v47 }
 0x3e2 PF: > { %s15_s18 = sadd.s32 1, %s2339_s18  }
 0x3e3   : > { %p12_p4 = scmp.ge.s32.totalorder %s15_s18, 4  }
 0x3e5   :  { %14 = sbr.rel (!%p12_p4) target bundleno = 1 (0x1), region = 70 }

</bundles_post_ra>
